<compile_context>
chip_gen: v6e
topology: v6e:2x2x1
jax: 0.10.0
libtpu: 0.0.40
codegen_flags: <defaults>
</compile_context>

<pallas_src>
import functools

import jax
import jax.numpy as jnp
from jax.experimental import pallas as pl
from jax.experimental.pallas import tpu as pltpu

LANE = 128
_NEG = -1e30  # stand-in for the -inf padding value of MaxPool2d(padding=1)


def _round_up(v, m):
    return ((v + m - 1) // m) * m


# Column layout of the packed per-d-channel parameter slab, shape (dp, 16) f32.
# Every column is a (dp,) vector with the padded rows (>= nf) exactly zero.
_COL_CONV_B = 0
_COL_LN1_G, _COL_LN1_B = 1, 2
_COL_LN2_G, _COL_LN2_B = 3, 4
_COL_LN3_G, _COL_LN3_B = 5, 6
_COL_MLP_B2 = 7
_COL_POOL_W = 8
_COL_POOL_B = 9            # scalar, stored at row 0
_VEC_COLS = 16


# -----------------------------------------------------------------------------
# Fused kernel: conv tokenizer + max-pool + external-attention block + seq-pool
# + classifier.  One grid step per batch tile; everything stays in VMEM.
# Layout: channels on sublanes (dp), tokens on lanes.
# -----------------------------------------------------------------------------
def _make_cvt_kernel(d_true, wo):
    def kernel(p_ref, cw_ref, mk_ref, pb_ref, mv_ref, w1_ref, w2_ref,
               fcw_ref, vec_ref, b1_ref, fcb_ref, o_ref):
        tb = p_ref.shape[0]            # images per grid step
        hw = p_ref.shape[2]            # conv positions per image (H*W)
        n = hw // 4                    # pooled tokens per image (Ho*Wo)
        dp = cw_ref.shape[0]           # padded embedding dim (sublanes)

        # ---- small per-channel parameters (padded rows are exactly 0) ----
        vec = vec_ref[...]                                     # (dp, 16) f32
        conv_b = vec[:, _COL_CONV_B:_COL_CONV_B + 1]
        ln1_g = vec[:, _COL_LN1_G:_COL_LN1_G + 1]
        ln1_b = vec[:, _COL_LN1_B:_COL_LN1_B + 1]
        ln2_g = vec[:, _COL_LN2_G:_COL_LN2_G + 1]
        ln2_b = vec[:, _COL_LN2_B:_COL_LN2_B + 1]
        ln3_g = vec[:, _COL_LN3_G:_COL_LN3_G + 1]
        ln3_b = vec[:, _COL_LN3_B:_COL_LN3_B + 1]
        mlp_b2 = vec[:, _COL_MLP_B2:_COL_MLP_B2 + 1]
        pool_w = vec[:, _COL_POOL_W:_COL_POOL_W + 1]
        pool_b = vec[0:1, _COL_POOL_B:_COL_POOL_B + 1]
        mlp_b1 = b1_ref[...]                                   # (hp, 1)
        fc_b = fcb_ref[...]                                    # (1, cp)
        fc_w = fcw_ref[...]                                    # (dp, cp)
        cwT = cw_ref[...]
        mkT = mk_ref[...]
        mvT = mv_ref[...]
        w1T = w1_ref[...]
        w2T = w2_ref[...]
        pb = pb_ref[...]                                       # (S, n)

        pad_rows = dp - d_true

        def layernorm(v, g, b, eps=1e-5):
            # LayerNorm over the d_true real channels (sublane axis).
            # INVARIANT: padded rows of v are exactly 0 and gamma/beta padded
            # rows are 0, so padded rows of the output stay exactly 0.
            mu = jnp.sum(v, axis=0, keepdims=True) / d_true
            ss = jnp.sum((v - mu) * (v - mu), axis=0, keepdims=True)
            var = (ss - pad_rows * mu * mu) / d_true
            return (v - mu) * jax.lax.rsqrt(var + eps) * g + b

        # Lane (token) index within the pooled Ho x Wo grid; col == 0 marks the
        # pool windows whose "column - 1" taps fall off the feature map.
        lane = jax.lax.broadcasted_iota(jnp.int32, (dp, n), 1)
        if wo & (wo - 1) == 0:
            col = jnp.bitwise_and(lane, wo - 1)
        else:
            col = lane % wo
        col_ok = col != 0

        def shift_tok(v, k):
            # out[:, m] = v[:, m-k] for m >= k, else _NEG  (pure lane shift)
            pad = jnp.full((v.shape[0], k), _NEG, v.dtype)
            return jnp.concatenate([pad, v[:, :v.shape[1] - k]], axis=-1)

        def mask_left(v):
            return jnp.where(col_ok, v, _NEG)

        for b in range(tb):
            # ---- conv 3x3 / pad 1 (one MXU matmul) + bias + ReLU ----
            # featT: (dp, H*W), token lanes ordered class-major by the parity
            # of the conv position: [ee | eo | oe | oo], each class Ho*Wo wide.
            feat = jnp.dot(cwT, p_ref[b], preferred_element_type=jnp.float32)
            feat = jnp.maximum(feat + conv_b, 0.0)

            # ---- max-pool 3x3 / stride 2 / pad 1 (9 taps, lane-dense) ----
            # Pool output (i,j) covers conv rows {2i-1,2i,2i+1} x cols
            # {2j-1,2j,2j+1}; grouped by parity these are the aligned entries
            # of the 4 class slabs plus their (-1 col / -1 row / -1 both)
            # lane-shifted copies, with off-map taps replaced by _NEG.
            c0 = feat[:, 0 * n:1 * n]      # (even row, even col)
            c1 = feat[:, 1 * n:2 * n]      # (even row, odd col)
            c2 = feat[:, 2 * n:3 * n]      # (odd row, even col)
            c3 = feat[:, 3 * n:4 * n]      # (odd row, odd col)
            m_cent = jnp.maximum(jnp.maximum(c0, c1), jnp.maximum(c2, c3))
            m_left = mask_left(jnp.maximum(shift_tok(c1, 1), shift_tok(c3, 1)))
            m_up = jnp.maximum(shift_tok(c2, wo), shift_tok(c3, wo))
            m_diag = mask_left(shift_tok(c3, wo + 1))
            x = jnp.maximum(jnp.maximum(m_cent, m_left),
                            jnp.maximum(m_up, m_diag))         # (dp, n)

            # ---- external attention (mk keys + pos_bias), pre-norm, residual
            xn = layernorm(x, ln1_g, ln1_b)
            attn = jnp.dot(mkT, xn.astype(jnp.bfloat16),
                           preferred_element_type=jnp.float32) + pb   # (S, n)
            attn = attn - jnp.max(attn, axis=-1, keepdims=True)       # over tokens
            attn = jnp.exp(attn)
            attn = attn * pl.reciprocal(jnp.sum(attn, axis=-1, keepdims=True),
                                        approx=True)                  # softmax(tokens)
            attn = attn / (jnp.sum(attn, axis=0, keepdims=True) + 1e-9)  # L1 over slots
            ea = jnp.dot(mvT, attn.astype(jnp.bfloat16),
                         preferred_element_type=jnp.float32)          # (dp, n)
            x = x + ea

            # ---- MLP, pre-norm, residual ----
            xn2 = layernorm(x, ln2_g, ln2_b)
            h = jnp.dot(w1T, xn2.astype(jnp.bfloat16),
                        preferred_element_type=jnp.float32) + mlp_b1  # (hp, n)
            h = jax.nn.gelu(h, approximate=True)
            x = x + jnp.dot(w2T, h.astype(jnp.bfloat16),
                            preferred_element_type=jnp.float32) + mlp_b2

            # ---- final LN, sequence pooling, classifier ----
            xn3 = layernorm(x, ln3_g, ln3_b)
            a = jnp.sum(xn3 * pool_w, axis=0, keepdims=True) + pool_b  # (1, n)
            a = a - jnp.max(a, axis=-1, keepdims=True)
            a = jnp.exp(a)
            a = a / jnp.sum(a, axis=-1, keepdims=True)
            pooled = jnp.sum(xn3 * a, axis=-1, keepdims=True)          # (dp, 1)
            logits = jnp.sum(fc_w * pooled, axis=0, keepdims=True) + fc_b  # (1, cp)
            o_ref[b] = logits

    return kernel


# -----------------------------------------------------------------------------
# Parameter construction (deterministic, synthetic, pre-padded & pre-transposed)
# -----------------------------------------------------------------------------
def init_params(key, cin, nf, n_tokens, num_classes, s_mem=16, mlp_ratio=2):
    d, hm = nf, mlp_ratio * nf
    dp = _round_up(d, 32)            # channel dim -> sublanes
    hp = _round_up(hm, 32)
    cp = _round_up(num_classes, LANE)
    k9 = 9 * cin
    k9p = _round_up(k9, 32)
    scale = 0.02
    ks = jax.random.split(key, 8)

    def pad2(w, rows, cols):
        return jnp.pad(w, ((0, rows - w.shape[0]), (0, cols - w.shape[1])))

    # Transposed weight layouts: output channels on sublanes (rows).
    conv_wT = pad2(scale * jax.random.normal(ks[0], (d, k9)), dp, k9p)
    mkT = pad2(scale * jax.random.normal(ks[1], (s_mem, d)), s_mem, dp)
    pos_biasT = scale * jax.random.normal(ks[2], (s_mem, n_tokens))
    mvT = pad2(scale * jax.random.normal(ks[3], (d, s_mem)), dp, s_mem)
    w1T = pad2(scale * jax.random.normal(ks[4], (hm, d)), hp, dp)
    w2T = pad2(scale * jax.random.normal(ks[5], (d, hm)), dp, hp)
    fc_w = pad2(scale * jax.random.normal(ks[6], (d, num_classes)), dp, cp)
    pool_w = scale * jax.random.normal(ks[7], (d,))

    def col(v):
        return jnp.pad(v, (0, dp - v.shape[0]))[:, None]

    gamma = jnp.ones((d,))
    cols = [jnp.zeros((dp, 1))] * _VEC_COLS
    cols[_COL_CONV_B] = col(jnp.zeros((d,)))
    cols[_COL_LN1_G] = col(gamma)
    cols[_COL_LN1_B] = col(jnp.zeros((d,)))
    cols[_COL_LN2_G] = col(gamma)
    cols[_COL_LN2_B] = col(jnp.zeros((d,)))
    cols[_COL_LN3_G] = col(gamma)
    cols[_COL_LN3_B] = col(jnp.zeros((d,)))
    cols[_COL_MLP_B2] = col(jnp.zeros((d,)))
    cols[_COL_POOL_W] = col(pool_w)
    cols[_COL_POOL_B] = col(jnp.zeros((1,)))
    vec = jnp.concatenate(cols, axis=1).astype(jnp.float32)          # (dp, 16)

    return dict(
        conv_wT=conv_wT.astype(jnp.bfloat16),
        mkT=mkT.astype(jnp.bfloat16),
        pos_biasT=pos_biasT.astype(jnp.float32),
        mvT=mvT.astype(jnp.bfloat16),
        w1T=w1T.astype(jnp.bfloat16),
        w2T=w2T.astype(jnp.bfloat16),
        fc_w=fc_w.astype(jnp.float32),
        vec=vec,
        mlp_b1=jnp.zeros((hp, 1), jnp.float32),
        fc_b=jnp.zeros((1, cp), jnp.float32),
    )


# -----------------------------------------------------------------------------
# Forward wrapper (layout plumbing in XLA, all compute in one Pallas kernel)
# -----------------------------------------------------------------------------
@functools.partial(jax.jit, static_argnames=("nf", "num_classes", "block_b"))
def cvt_forward(x_nchw, params, *, nf, num_classes, block_b=1):
    B, cin, H, W = x_nchw.shape
    assert H % 2 == 0 and W % 2 == 0
    Ho, Wo = H // 2, W // 2
    N = Ho * Wo
    HW = H * W
    K9 = 9 * cin
    dp, K9p = params["conv_wT"].shape
    S = params["mkT"].shape[0]
    hp = params["w1T"].shape[0]
    cp = params["fc_w"].shape[1]

    tb = max(1, min(block_b, B))
    while B % tb:
        tb -= 1

    # ---- XLA glue: NHWC, bf16 early, im2col at the H*W unique conv positions,
    # tokens grouped by (row,col) parity so the in-kernel stride-2 max-pool
    # sees its 4 parity classes as contiguous lane slabs, then transposed so
    # the im2col K axis sits on sublanes and tokens on lanes. ----
    x = jnp.transpose(x_nchw, (0, 2, 3, 1)).astype(jnp.bfloat16)
    xp = jnp.pad(x, ((0, 0), (1, 1), (1, 1), (0, 0)))
    taps = [xp[:, ki:ki + H, kj:kj + W, :] for ki in range(3) for kj in range(3)]
    pfull = jnp.concatenate(taps, axis=-1)                      # (B, H, W, K9)
    classes = [pfull[:, pi::2, pj::2, :] for pi in range(2) for pj in range(2)]
    pcls = jnp.stack(classes, axis=1).reshape(B, 4 * N, K9)     # class-major tokens
    patchesT = jnp.transpose(pcls, (0, 2, 1))                   # (B, K9, H*W)
    patchesT = jnp.pad(patchesT, ((0, 0), (0, K9p - K9), (0, 0)))

    kernel = _make_cvt_kernel(d_true=nf, wo=Wo)

    flops = 2 * B * (HW * K9p * dp + 2 * N * dp * S + 2 * N * dp * hp + dp * cp)
    transcendentals = B * (S * N + 2 * N + hp * N)
    bytes_accessed = (int(patchesT.size) * 2
                      + sum(int(v.size) * v.dtype.itemsize for v in params.values())
                      + B * cp * 4)

    in_specs = [
        pl.BlockSpec((tb, K9p, HW), lambda b: (b, 0, 0)),        # patches^T
        pl.BlockSpec(params["conv_wT"].shape, lambda b: (0, 0)),
        pl.BlockSpec(params["mkT"].shape, lambda b: (0, 0)),
        pl.BlockSpec(params["pos_biasT"].shape, lambda b: (0, 0)),
        pl.BlockSpec(params["mvT"].shape, lambda b: (0, 0)),
        pl.BlockSpec(params["w1T"].shape, lambda b: (0, 0)),
        pl.BlockSpec(params["w2T"].shape, lambda b: (0, 0)),
        pl.BlockSpec(params["fc_w"].shape, lambda b: (0, 0)),
        pl.BlockSpec(params["vec"].shape, lambda b: (0, 0)),
        pl.BlockSpec(params["mlp_b1"].shape, lambda b: (0, 0)),
        pl.BlockSpec(params["fc_b"].shape, lambda b: (0, 0)),
    ]
    out_specs = pl.BlockSpec((tb, 1, cp), lambda b: (b, 0, 0))

    logits = pl.pallas_call(
        kernel,
        grid=(B // tb,),
        in_specs=in_specs,
        out_specs=out_specs,
        out_shape=jax.ShapeDtypeStruct((B, 1, cp), jnp.float32),
        compiler_params=pltpu.CompilerParams(
            dimension_semantics=("parallel",),
            vmem_limit_bytes=16 * 1024 * 1024,
        ),
        cost_estimate=pl.CostEstimate(
            flops=flops,
            transcendentals=transcendentals,
            bytes_accessed=bytes_accessed,
        ),
    )(patchesT, params["conv_wT"], params["mkT"], params["pos_biasT"],
      params["mvT"], params["w1T"], params["w2T"], params["fc_w"],
      params["vec"], params["mlp_b1"], params["fc_b"])

    return logits[:, 0, :num_classes]


# -----------------------------------------------------------------------------
if __name__ == "__main__":
    B, CIN, IMG = 4, 3, 32          # small CVT: image_size=32, RGB input
    NF = 20                         # nf (embedding dim), module default
    NUM_CLASSES = 10                # output_size
    N_TOKENS = (IMG // 2) * (IMG // 2)

    key = jax.random.PRNGKey(0)
    kx, kp = jax.random.split(key)
    x = jax.random.normal(kx, (B, CIN, IMG, IMG), jnp.float32)
    params = init_params(kp, CIN, NF, N_TOKENS, NUM_CLASSES)

    out = cvt_forward(x, params, nf=NF, num_classes=NUM_CLASSES, block_b=1)
    out = jax.block_until_ready(out)
    assert out.shape == (B, NUM_CLASSES)
    assert bool(jnp.all(jnp.isfinite(out)))
    print("KERNEL_OK")
</pallas_src>

<mosaic_0001>
module attributes {stable_mosaic.version = 11 : i64} {
  func.func @kernel(%arg0: i32, %arg1: memref<1x32x1024xbf16, #tpu.memory_space<vmem>>, %arg2: memref<32x32xbf16, #tpu.memory_space<vmem>>, %arg3: memref<16x32xbf16, #tpu.memory_space<vmem>>, %arg4: memref<16x256xf32, #tpu.memory_space<vmem>>, %arg5: memref<32x16xbf16, #tpu.memory_space<vmem>>, %arg6: memref<64x32xbf16, #tpu.memory_space<vmem>>, %arg7: memref<32x64xbf16, #tpu.memory_space<vmem>>, %arg8: memref<32x128xf32, #tpu.memory_space<vmem>>, %arg9: memref<32x16xf32, #tpu.memory_space<vmem>>, %arg10: memref<64x1xf32, #tpu.memory_space<vmem>>, %arg11: memref<1x128xf32, #tpu.memory_space<vmem>>, %arg12: memref<1x1x128xf32, #tpu.memory_space<vmem>>) attributes {dimension_semantics = [#tpu.dimension_semantics<parallel>], iteration_bounds = array<i64: 4>, scalar_prefetch = 0 : i64, scratch_operands = 0 : i64, tpu.core_type = #tpu.core_type<tc>, window_params = [{transform_indices = @transform_0, window_bounds = array<i64: 1, 32, 1024>}, {pipeline_mode = #tpu.pipeline_mode<synchronous>, transform_indices = @transform_1, window_bounds = array<i64: 32, 32>}, {pipeline_mode = #tpu.pipeline_mode<synchronous>, transform_indices = @transform_2, window_bounds = array<i64: 16, 32>}, {pipeline_mode = #tpu.pipeline_mode<synchronous>, transform_indices = @transform_3, window_bounds = array<i64: 16, 256>}, {pipeline_mode = #tpu.pipeline_mode<synchronous>, transform_indices = @transform_4, window_bounds = array<i64: 32, 16>}, {pipeline_mode = #tpu.pipeline_mode<synchronous>, transform_indices = @transform_5, window_bounds = array<i64: 64, 32>}, {pipeline_mode = #tpu.pipeline_mode<synchronous>, transform_indices = @transform_6, window_bounds = array<i64: 32, 64>}, {pipeline_mode = #tpu.pipeline_mode<synchronous>, transform_indices = @transform_7, window_bounds = array<i64: 32, 128>}, {pipeline_mode = #tpu.pipeline_mode<synchronous>, transform_indices = @transform_8, window_bounds = array<i64: 32, 16>}, {pipeline_mode = #tpu.pipeline_mode<synchronous>, transform_indices = @transform_9, window_bounds = array<i64: 64, 1>}, {pipeline_mode = #tpu.pipeline_mode<synchronous>, transform_indices = @transform_10, window_bounds = array<i64: 1, 128>}, {transform_indices = @transform_11, window_bounds = array<i64: 1, 1, 128>}]} {
    %c0 = arith.constant 0 : index
    %c0_0 = arith.constant 0 : index
    %0 = vector.load %arg9[%c0, %c0_0] : memref<32x16xf32, #tpu.memory_space<vmem>>, vector<32x16xf32>
    %1 = vector.extract_strided_slice %0 {offsets = [0, 0], sizes = [32, 1], strides = [1, 1]} : vector<32x16xf32> to vector<32x1xf32>
    %2 = vector.extract_strided_slice %0 {offsets = [0, 1], sizes = [32, 1], strides = [1, 1]} : vector<32x16xf32> to vector<32x1xf32>
    %3 = vector.extract_strided_slice %0 {offsets = [0, 2], sizes = [32, 1], strides = [1, 1]} : vector<32x16xf32> to vector<32x1xf32>
    %4 = vector.extract_strided_slice %0 {offsets = [0, 3], sizes = [32, 1], strides = [1, 1]} : vector<32x16xf32> to vector<32x1xf32>
    %5 = vector.extract_strided_slice %0 {offsets = [0, 4], sizes = [32, 1], strides = [1, 1]} : vector<32x16xf32> to vector<32x1xf32>
    %6 = vector.extract_strided_slice %0 {offsets = [0, 5], sizes = [32, 1], strides = [1, 1]} : vector<32x16xf32> to vector<32x1xf32>
    %7 = vector.extract_strided_slice %0 {offsets = [0, 6], sizes = [32, 1], strides = [1, 1]} : vector<32x16xf32> to vector<32x1xf32>
    %8 = vector.extract_strided_slice %0 {offsets = [0, 7], sizes = [32, 1], strides = [1, 1]} : vector<32x16xf32> to vector<32x1xf32>
    %9 = vector.extract_strided_slice %0 {offsets = [0, 8], sizes = [32, 1], strides = [1, 1]} : vector<32x16xf32> to vector<32x1xf32>
    %10 = vector.extract_strided_slice %0 {offsets = [0, 9], sizes = [1, 1], strides = [1, 1]} : vector<32x16xf32> to vector<1x1xf32>
    %c0_1 = arith.constant 0 : index
    %c0_2 = arith.constant 0 : index
    %11 = vector.load %arg10[%c0_1, %c0_2] : memref<64x1xf32, #tpu.memory_space<vmem>>, vector<64x1xf32>
    %c0_3 = arith.constant 0 : index
    %c0_4 = arith.constant 0 : index
    %12 = vector.load %arg11[%c0_3, %c0_4] : memref<1x128xf32, #tpu.memory_space<vmem>>, vector<1x128xf32>
    %c0_5 = arith.constant 0 : index
    %c0_6 = arith.constant 0 : index
    %13 = vector.load %arg8[%c0_5, %c0_6] : memref<32x128xf32, #tpu.memory_space<vmem>>, vector<32x128xf32>
    %c0_7 = arith.constant 0 : index
    %c0_8 = arith.constant 0 : index
    %14 = vector.load %arg2[%c0_7, %c0_8] : memref<32x32xbf16, #tpu.memory_space<vmem>>, vector<32x32xbf16>
    %c0_9 = arith.constant 0 : index
    %c0_10 = arith.constant 0 : index
    %15 = vector.load %arg3[%c0_9, %c0_10] : memref<16x32xbf16, #tpu.memory_space<vmem>>, vector<16x32xbf16>
    %c0_11 = arith.constant 0 : index
    %c0_12 = arith.constant 0 : index
    %16 = vector.load %arg5[%c0_11, %c0_12] : memref<32x16xbf16, #tpu.memory_space<vmem>>, vector<32x16xbf16>
    %c0_13 = arith.constant 0 : index
    %c0_14 = arith.constant 0 : index
    %17 = vector.load %arg6[%c0_13, %c0_14] : memref<64x32xbf16, #tpu.memory_space<vmem>>, vector<64x32xbf16>
    %c0_15 = arith.constant 0 : index
    %c0_16 = arith.constant 0 : index
    %18 = vector.load %arg7[%c0_15, %c0_16] : memref<32x64xbf16, #tpu.memory_space<vmem>>, vector<32x64xbf16>
    %c0_17 = arith.constant 0 : index
    %c0_18 = arith.constant 0 : index
    %19 = vector.load %arg4[%c0_17, %c0_18] : memref<16x256xf32, #tpu.memory_space<vmem>>, vector<16x256xf32>
    %20 = tpu.iota {dimensions = array<i32: 1>} : vector<32x256xi32>
    %c15_i32 = arith.constant 15 : i32
    %21 = vector.broadcast %c15_i32 : i32 to vector<32x256xi32>
    %22 = arith.andi %20, %21 : vector<32x256xi32>
    %c0_i32 = arith.constant 0 : i32
    %23 = vector.broadcast %c0_i32 : i32 to vector<32x256xi32>
    %24 = arith.cmpi ne, %22, %23 : vector<32x256xi32>
    %c0_19 = arith.constant 0 : index
    %c0_20 = arith.constant 0 : index
    %c0_21 = arith.constant 0 : index
    %25 = vector.load %arg1[%c0_19, %c0_20, %c0_21] : memref<1x32x1024xbf16, #tpu.memory_space<vmem>>, vector<1x32x1024xbf16>
    %26 = vector.shape_cast %25 : vector<1x32x1024xbf16> to vector<32x1024xbf16>
    %cst = arith.constant dense<0.000000e+00> : vector<32x1024xf32>
    %27 = tpu.matmul %14, %26, %cst {dimension_numbers = #tpu.dot_dimension_numbers<[1], [0], [0], [1], [0, 0, 1, 1], [], []>} : vector<32x32xbf16>, vector<32x1024xbf16>, vector<32x1024xf32> -> vector<32x1024xf32>
    %28 = vector.broadcast %1 : vector<32x1xf32> to vector<32x1024xf32>
    %29 = arith.addf %27, %28 : vector<32x1024xf32>
    %cst_22 = arith.constant 0.000000e+00 : f32
    %30 = vector.broadcast %cst_22 : f32 to vector<32x1024xf32>
    %31 = arith.maximumf %29, %30 : vector<32x1024xf32>
    %32 = vector.extract_strided_slice %31 {offsets = [0, 0], sizes = [32, 256], strides = [1, 1]} : vector<32x1024xf32> to vector<32x256xf32>
    %33 = vector.extract_strided_slice %31 {offsets = [0, 256], sizes = [32, 256], strides = [1, 1]} : vector<32x1024xf32> to vector<32x256xf32>
    %34 = vector.extract_strided_slice %31 {offsets = [0, 512], sizes = [32, 256], strides = [1, 1]} : vector<32x1024xf32> to vector<32x256xf32>
    %35 = vector.extract_strided_slice %31 {offsets = [0, 768], sizes = [32, 256], strides = [1, 1]} : vector<32x1024xf32> to vector<32x256xf32>
    %36 = arith.maximumf %32, %33 : vector<32x256xf32>
    %37 = arith.maximumf %34, %35 : vector<32x256xf32>
    %38 = arith.maximumf %36, %37 : vector<32x256xf32>
    %cst_23 = arith.constant -1.000000e+30 : f32
    %39 = vector.broadcast %cst_23 : f32 to vector<32x1xf32>
    %40 = vector.extract_strided_slice %33 {offsets = [0, 0], sizes = [32, 255], strides = [1, 1]} : vector<32x256xf32> to vector<32x255xf32>
    %41 = tpu.concatenate %39, %40 in 1 : vector<32x1xf32>, vector<32x255xf32> -> vector<32x256xf32>
    %cst_24 = arith.constant -1.000000e+30 : f32
    %42 = vector.broadcast %cst_24 : f32 to vector<32x1xf32>
    %43 = vector.extract_strided_slice %35 {offsets = [0, 0], sizes = [32, 255], strides = [1, 1]} : vector<32x256xf32> to vector<32x255xf32>
    %44 = tpu.concatenate %42, %43 in 1 : vector<32x1xf32>, vector<32x255xf32> -> vector<32x256xf32>
    %45 = arith.maximumf %41, %44 : vector<32x256xf32>
    %cst_25 = arith.constant -1.000000e+30 : f32
    %46 = vector.broadcast %cst_25 : f32 to vector<32x256xf32>
    %47 = arith.select %24, %45, %46 : vector<32x256xi1>, vector<32x256xf32>
    %cst_26 = arith.constant -1.000000e+30 : f32
    %48 = vector.broadcast %cst_26 : f32 to vector<32x16xf32>
    %49 = vector.extract_strided_slice %34 {offsets = [0, 0], sizes = [32, 240], strides = [1, 1]} : vector<32x256xf32> to vector<32x240xf32>
    %50 = tpu.concatenate %48, %49 in 1 : vector<32x16xf32>, vector<32x240xf32> -> vector<32x256xf32>
    %cst_27 = arith.constant -1.000000e+30 : f32
    %51 = vector.broadcast %cst_27 : f32 to vector<32x16xf32>
    %52 = vector.extract_strided_slice %35 {offsets = [0, 0], sizes = [32, 240], strides = [1, 1]} : vector<32x256xf32> to vector<32x240xf32>
    %53 = tpu.concatenate %51, %52 in 1 : vector<32x16xf32>, vector<32x240xf32> -> vector<32x256xf32>
    %54 = arith.maximumf %50, %53 : vector<32x256xf32>
    %cst_28 = arith.constant -1.000000e+30 : f32
    %55 = vector.broadcast %cst_28 : f32 to vector<32x17xf32>
    %56 = vector.extract_strided_slice %35 {offsets = [0, 0], sizes = [32, 239], strides = [1, 1]} : vector<32x256xf32> to vector<32x239xf32>
    %57 = tpu.concatenate %55, %56 in 1 : vector<32x17xf32>, vector<32x239xf32> -> vector<32x256xf32>
    %cst_29 = arith.constant -1.000000e+30 : f32
    %58 = vector.broadcast %cst_29 : f32 to vector<32x256xf32>
    %59 = arith.select %24, %57, %58 : vector<32x256xi1>, vector<32x256xf32>
    %60 = arith.maximumf %38, %47 : vector<32x256xf32>
    %61 = arith.maximumf %54, %59 : vector<32x256xf32>
    %62 = arith.maximumf %60, %61 : vector<32x256xf32>
    %cst_30 = arith.constant dense<0.000000e+00> : vector<256xf32>
    %63 = vector.multi_reduction <add>, %62, %cst_30 [0] : vector<32x256xf32> to vector<256xf32>
    %64 = vector.shape_cast %63 : vector<256xf32> to vector<1x256xf32>
    %cst_31 = arith.constant 2.000000e+01 : f32
    %65 = vector.broadcast %cst_31 : f32 to vector<1x256xf32>
    %66 = arith.divf %64, %65 : vector<1x256xf32>
    %67 = vector.broadcast %66 : vector<1x256xf32> to vector<32x256xf32>
    %68 = arith.subf %62, %67 : vector<32x256xf32>
    %69 = vector.broadcast %66 : vector<1x256xf32> to vector<32x256xf32>
    %70 = arith.subf %62, %69 : vector<32x256xf32>
    %71 = arith.mulf %68, %70 : vector<32x256xf32>
    %cst_32 = arith.constant dense<0.000000e+00> : vector<256xf32>
    %72 = vector.multi_reduction <add>, %71, %cst_32 [0] : vector<32x256xf32> to vector<256xf32>
    %73 = vector.shape_cast %72 : vector<256xf32> to vector<1x256xf32>
    %cst_33 = arith.constant 1.200000e+01 : f32
    %74 = vector.broadcast %cst_33 : f32 to vector<1x256xf32>
    %75 = arith.mulf %74, %66 : vector<1x256xf32>
    %76 = arith.mulf %75, %66 : vector<1x256xf32>
    %77 = arith.subf %73, %76 : vector<1x256xf32>
    %cst_34 = arith.constant 2.000000e+01 : f32
    %78 = vector.broadcast %cst_34 : f32 to vector<1x256xf32>
    %79 = arith.divf %77, %78 : vector<1x256xf32>
    %80 = vector.broadcast %66 : vector<1x256xf32> to vector<32x256xf32>
    %81 = arith.subf %62, %80 : vector<32x256xf32>
    %cst_35 = arith.constant 9.99999974E-6 : f32
    %82 = vector.broadcast %cst_35 : f32 to vector<1x256xf32>
    %83 = arith.addf %79, %82 : vector<1x256xf32>
    %84 = math.rsqrt %83 : vector<1x256xf32>
    %85 = vector.broadcast %84 : vector<1x256xf32> to vector<32x256xf32>
    %86 = arith.mulf %81, %85 : vector<32x256xf32>
    %87 = vector.broadcast %2 : vector<32x1xf32> to vector<32x256xf32>
    %88 = arith.mulf %86, %87 : vector<32x256xf32>
    %89 = vector.broadcast %3 : vector<32x1xf32> to vector<32x256xf32>
    %90 = arith.addf %88, %89 : vector<32x256xf32>
    %91 = arith.truncf %90 : vector<32x256xf32> to vector<32x256xbf16>
    %cst_36 = arith.constant dense<0.000000e+00> : vector<16x256xf32>
    %92 = tpu.matmul %15, %91, %cst_36 {dimension_numbers = #tpu.dot_dimension_numbers<[1], [0], [0], [1], [0, 0, 1, 1], [], []>} : vector<16x32xbf16>, vector<32x256xbf16>, vector<16x256xf32> -> vector<16x256xf32>
    %93 = arith.addf %92, %19 : vector<16x256xf32>
    %cst_37 = arith.constant dense<0xFF800000> : vector<16xf32>
    %94 = vector.multi_reduction <maximumf>, %93, %cst_37 [1] : vector<16x256xf32> to vector<16xf32>
    %95 = vector.shape_cast %94 : vector<16xf32> to vector<16x1xf32>
    %96 = vector.broadcast %95 : vector<16x1xf32> to vector<16x256xf32>
    %97 = arith.subf %93, %96 : vector<16x256xf32>
    %98 = math.exp %97 : vector<16x256xf32>
    %cst_38 = arith.constant dense<0.000000e+00> : vector<16xf32>
    %99 = vector.multi_reduction <add>, %98, %cst_38 [1] : vector<16x256xf32> to vector<16xf32>
    %100 = vector.shape_cast %99 : vector<16xf32> to vector<16x1xf32>
    %101 = tpu.reciprocal %100 {approx = true} : vector<16x1xf32> -> vector<16x1xf32>
    %102 = vector.broadcast %101 : vector<16x1xf32> to vector<16x256xf32>
    %103 = arith.mulf %98, %102 : vector<16x256xf32>
    %cst_39 = arith.constant dense<0.000000e+00> : vector<256xf32>
    %104 = vector.multi_reduction <add>, %103, %cst_39 [0] : vector<16x256xf32> to vector<256xf32>
    %105 = vector.shape_cast %104 : vector<256xf32> to vector<1x256xf32>
    %cst_40 = arith.constant 9.99999971E-10 : f32
    %106 = vector.broadcast %cst_40 : f32 to vector<1x256xf32>
    %107 = arith.addf %105, %106 : vector<1x256xf32>
    %108 = vector.broadcast %107 : vector<1x256xf32> to vector<16x256xf32>
    %109 = arith.divf %103, %108 : vector<16x256xf32>
    %110 = arith.truncf %109 : vector<16x256xf32> to vector<16x256xbf16>
    %cst_41 = arith.constant dense<0.000000e+00> : vector<32x256xf32>
    %111 = tpu.matmul %16, %110, %cst_41 {dimension_numbers = #tpu.dot_dimension_numbers<[1], [0], [0], [1], [0, 0, 1, 1], [], []>} : vector<32x16xbf16>, vector<16x256xbf16>, vector<32x256xf32> -> vector<32x256xf32>
    %112 = arith.addf %62, %111 : vector<32x256xf32>
    %cst_42 = arith.constant dense<0.000000e+00> : vector<256xf32>
    %113 = vector.multi_reduction <add>, %112, %cst_42 [0] : vector<32x256xf32> to vector<256xf32>
    %114 = vector.shape_cast %113 : vector<256xf32> to vector<1x256xf32>
    %cst_43 = arith.constant 2.000000e+01 : f32
    %115 = vector.broadcast %cst_43 : f32 to vector<1x256xf32>
    %116 = arith.divf %114, %115 : vector<1x256xf32>
    %117 = vector.broadcast %116 : vector<1x256xf32> to vector<32x256xf32>
    %118 = arith.subf %112, %117 : vector<32x256xf32>
    %119 = vector.broadcast %116 : vector<1x256xf32> to vector<32x256xf32>
    %120 = arith.subf %112, %119 : vector<32x256xf32>
    %121 = arith.mulf %118, %120 : vector<32x256xf32>
    %cst_44 = arith.constant dense<0.000000e+00> : vector<256xf32>
    %122 = vector.multi_reduction <add>, %121, %cst_44 [0] : vector<32x256xf32> to vector<256xf32>
    %123 = vector.shape_cast %122 : vector<256xf32> to vector<1x256xf32>
    %cst_45 = arith.constant 1.200000e+01 : f32
    %124 = vector.broadcast %cst_45 : f32 to vector<1x256xf32>
    %125 = arith.mulf %124, %116 : vector<1x256xf32>
    %126 = arith.mulf %125, %116 : vector<1x256xf32>
    %127 = arith.subf %123, %126 : vector<1x256xf32>
    %cst_46 = arith.constant 2.000000e+01 : f32
    %128 = vector.broadcast %cst_46 : f32 to vector<1x256xf32>
    %129 = arith.divf %127, %128 : vector<1x256xf32>
    %130 = vector.broadcast %116 : vector<1x256xf32> to vector<32x256xf32>
    %131 = arith.subf %112, %130 : vector<32x256xf32>
    %cst_47 = arith.constant 9.99999974E-6 : f32
    %132 = vector.broadcast %cst_47 : f32 to vector<1x256xf32>
    %133 = arith.addf %129, %132 : vector<1x256xf32>
    %134 = math.rsqrt %133 : vector<1x256xf32>
    %135 = vector.broadcast %134 : vector<1x256xf32> to vector<32x256xf32>
    %136 = arith.mulf %131, %135 : vector<32x256xf32>
    %137 = vector.broadcast %4 : vector<32x1xf32> to vector<32x256xf32>
    %138 = arith.mulf %136, %137 : vector<32x256xf32>
    %139 = vector.broadcast %5 : vector<32x1xf32> to vector<32x256xf32>
    %140 = arith.addf %138, %139 : vector<32x256xf32>
    %141 = arith.truncf %140 : vector<32x256xf32> to vector<32x256xbf16>
    %cst_48 = arith.constant dense<0.000000e+00> : vector<64x256xf32>
    %142 = tpu.matmul %17, %141, %cst_48 {dimension_numbers = #tpu.dot_dimension_numbers<[1], [0], [0], [1], [0, 0, 1, 1], [], []>} : vector<64x32xbf16>, vector<32x256xbf16>, vector<64x256xf32> -> vector<64x256xf32>
    %143 = vector.broadcast %11 : vector<64x1xf32> to vector<64x256xf32>
    %144 = arith.addf %142, %143 : vector<64x256xf32>
    %145 = arith.mulf %144, %144 : vector<64x256xf32>
    %146 = arith.mulf %144, %145 : vector<64x256xf32>
    %cst_49 = arith.constant 4.471500e-02 : f32
    %147 = vector.broadcast %cst_49 : f32 to vector<64x256xf32>
    %148 = arith.mulf %147, %146 : vector<64x256xf32>
    %149 = arith.addf %144, %148 : vector<64x256xf32>
    %cst_50 = arith.constant 0.797884583 : f32
    %150 = vector.broadcast %cst_50 : f32 to vector<64x256xf32>
    %151 = arith.mulf %150, %149 : vector<64x256xf32>
    %152 = math.tanh %151 : vector<64x256xf32>
    %cst_51 = arith.constant 1.000000e+00 : f32
    %153 = vector.broadcast %cst_51 : f32 to vector<64x256xf32>
    %154 = arith.addf %153, %152 : vector<64x256xf32>
    %cst_52 = arith.constant 5.000000e-01 : f32
    %155 = vector.broadcast %cst_52 : f32 to vector<64x256xf32>
    %156 = arith.mulf %155, %154 : vector<64x256xf32>
    %157 = arith.mulf %144, %156 : vector<64x256xf32>
    %158 = arith.truncf %157 : vector<64x256xf32> to vector<64x256xbf16>
    %cst_53 = arith.constant dense<0.000000e+00> : vector<32x256xf32>
    %159 = tpu.matmul %18, %158, %cst_53 {dimension_numbers = #tpu.dot_dimension_numbers<[1], [0], [0], [1], [0, 0, 1, 1], [], []>} : vector<32x64xbf16>, vector<64x256xbf16>, vector<32x256xf32> -> vector<32x256xf32>
    %160 = arith.addf %112, %159 : vector<32x256xf32>
    %161 = vector.broadcast %8 : vector<32x1xf32> to vector<32x256xf32>
    %162 = arith.addf %160, %161 : vector<32x256xf32>
    %cst_54 = arith.constant dense<0.000000e+00> : vector<256xf32>
    %163 = vector.multi_reduction <add>, %162, %cst_54 [0] : vector<32x256xf32> to vector<256xf32>
    %164 = vector.shape_cast %163 : vector<256xf32> to vector<1x256xf32>
    %cst_55 = arith.constant 2.000000e+01 : f32
    %165 = vector.broadcast %cst_55 : f32 to vector<1x256xf32>
    %166 = arith.divf %164, %165 : vector<1x256xf32>
    %167 = vector.broadcast %166 : vector<1x256xf32> to vector<32x256xf32>
    %168 = arith.subf %162, %167 : vector<32x256xf32>
    %169 = vector.broadcast %166 : vector<1x256xf32> to vector<32x256xf32>
    %170 = arith.subf %162, %169 : vector<32x256xf32>
    %171 = arith.mulf %168, %170 : vector<32x256xf32>
    %cst_56 = arith.constant dense<0.000000e+00> : vector<256xf32>
    %172 = vector.multi_reduction <add>, %171, %cst_56 [0] : vector<32x256xf32> to vector<256xf32>
    %173 = vector.shape_cast %172 : vector<256xf32> to vector<1x256xf32>
    %cst_57 = arith.constant 1.200000e+01 : f32
    %174 = vector.broadcast %cst_57 : f32 to vector<1x256xf32>
    %175 = arith.mulf %174, %166 : vector<1x256xf32>
    %176 = arith.mulf %175, %166 : vector<1x256xf32>
    %177 = arith.subf %173, %176 : vector<1x256xf32>
    %cst_58 = arith.constant 2.000000e+01 : f32
    %178 = vector.broadcast %cst_58 : f32 to vector<1x256xf32>
    %179 = arith.divf %177, %178 : vector<1x256xf32>
    %180 = vector.broadcast %166 : vector<1x256xf32> to vector<32x256xf32>
    %181 = arith.subf %162, %180 : vector<32x256xf32>
    %cst_59 = arith.constant 9.99999974E-6 : f32
    %182 = vector.broadcast %cst_59 : f32 to vector<1x256xf32>
    %183 = arith.addf %179, %182 : vector<1x256xf32>
    %184 = math.rsqrt %183 : vector<1x256xf32>
    %185 = vector.broadcast %184 : vector<1x256xf32> to vector<32x256xf32>
    %186 = arith.mulf %181, %185 : vector<32x256xf32>
    %187 = vector.broadcast %6 : vector<32x1xf32> to vector<32x256xf32>
    %188 = arith.mulf %186, %187 : vector<32x256xf32>
    %189 = vector.broadcast %7 : vector<32x1xf32> to vector<32x256xf32>
    %190 = arith.addf %188, %189 : vector<32x256xf32>
    %191 = vector.broadcast %9 : vector<32x1xf32> to vector<32x256xf32>
    %192 = arith.mulf %190, %191 : vector<32x256xf32>
    %cst_60 = arith.constant dense<0.000000e+00> : vector<256xf32>
    %193 = vector.multi_reduction <add>, %192, %cst_60 [0] : vector<32x256xf32> to vector<256xf32>
    %194 = vector.shape_cast %193 : vector<256xf32> to vector<1x256xf32>
    %195 = vector.broadcast %10 : vector<1x1xf32> to vector<1x256xf32>
    %196 = arith.addf %194, %195 : vector<1x256xf32>
    %cst_61 = arith.constant dense<0xFF800000> : vector<1xf32>
    %197 = vector.multi_reduction <maximumf>, %196, %cst_61 [1] : vector<1x256xf32> to vector<1xf32>
    %198 = vector.shape_cast %197 : vector<1xf32> to vector<1x1xf32>
    %199 = vector.broadcast %198 : vector<1x1xf32> to vector<1x256xf32>
    %200 = arith.subf %196, %199 : vector<1x256xf32>
    %201 = math.exp %200 : vector<1x256xf32>
    %cst_62 = arith.constant dense<0.000000e+00> : vector<1xf32>
    %202 = vector.multi_reduction <add>, %201, %cst_62 [1] : vector<1x256xf32> to vector<1xf32>
    %203 = vector.shape_cast %202 : vector<1xf32> to vector<1x1xf32>
    %204 = vector.broadcast %203 : vector<1x1xf32> to vector<1x256xf32>
    %205 = arith.divf %201, %204 : vector<1x256xf32>
    %206 = vector.broadcast %205 : vector<1x256xf32> to vector<32x256xf32>
    %207 = arith.mulf %190, %206 : vector<32x256xf32>
    %cst_63 = arith.constant dense<0.000000e+00> : vector<32xf32>
    %208 = vector.multi_reduction <add>, %207, %cst_63 [1] : vector<32x256xf32> to vector<32xf32>
    %209 = vector.shape_cast %208 : vector<32xf32> to vector<32x1xf32>
    %210 = vector.broadcast %209 : vector<32x1xf32> to vector<32x128xf32>
    %211 = arith.mulf %13, %210 : vector<32x128xf32>
    %cst_64 = arith.constant dense<0.000000e+00> : vector<128xf32>
    %212 = vector.multi_reduction <add>, %211, %cst_64 [0] : vector<32x128xf32> to vector<128xf32>
    %213 = vector.shape_cast %212 : vector<128xf32> to vector<1x128xf32>
    %214 = arith.addf %213, %12 : vector<1x128xf32>
    %c0_65 = arith.constant 0 : index
    %c0_66 = arith.constant 0 : index
    %c0_67 = arith.constant 0 : index
    %215 = vector.load %arg12[%c0_65, %c0_66, %c0_67] : memref<1x1x128xf32, #tpu.memory_space<vmem>>, vector<1x1x128xf32>
    %216 = vector.shape_cast %215 : vector<1x1x128xf32> to vector<1x128xf32>
    %217 = vector.shape_cast %214 : vector<1x128xf32> to vector<1x1x128xf32>
    tpu.vector_store %arg12[%c0_65, %c0_66, %c0_67], %217 {strides = array<i32>} : memref<1x1x128xf32, #tpu.memory_space<vmem>>, vector<1x1x128xf32>,
    return
  }
  func.func @transform_0(%arg0: i32) -> (i32, i32, i32) {
    %c0_i32 = arith.constant 0 : i32
    %c0_i32_0 = arith.constant 0 : i32
    %c0_i32_1 = arith.constant 0 : i32
    return %arg0, %c0_i32, %c0_i32_0 : i32, i32, i32
  }
  func.func @transform_1(%arg0: i32) -> (i32, i32) {
    %c0_i32 = arith.constant 0 : i32
    %c0_i32_0 = arith.constant 0 : i32
    %c0_i32_1 = arith.constant 0 : i32
    return %c0_i32, %c0_i32_0 : i32, i32
  }
  func.func @transform_2(%arg0: i32) -> (i32, i32) {
    %c0_i32 = arith.constant 0 : i32
    %c0_i32_0 = arith.constant 0 : i32
    %c0_i32_1 = arith.constant 0 : i32
    return %c0_i32, %c0_i32_0 : i32, i32
  }
  func.func @transform_3(%arg0: i32) -> (i32, i32) {
    %c0_i32 = arith.constant 0 : i32
    %c0_i32_0 = arith.constant 0 : i32
    %c0_i32_1 = arith.constant 0 : i32
    return %c0_i32, %c0_i32_0 : i32, i32
  }
  func.func @transform_4(%arg0: i32) -> (i32, i32) {
    %c0_i32 = arith.constant 0 : i32
    %c0_i32_0 = arith.constant 0 : i32
    %c0_i32_1 = arith.constant 0 : i32
    return %c0_i32, %c0_i32_0 : i32, i32
  }
  func.func @transform_5(%arg0: i32) -> (i32, i32) {
    %c0_i32 = arith.constant 0 : i32
    %c0_i32_0 = arith.constant 0 : i32
    %c0_i32_1 = arith.constant 0 : i32
    return %c0_i32, %c0_i32_0 : i32, i32
  }
  func.func @transform_6(%arg0: i32) -> (i32, i32) {
    %c0_i32 = arith.constant 0 : i32
    %c0_i32_0 = arith.constant 0 : i32
    %c0_i32_1 = arith.constant 0 : i32
    return %c0_i32, %c0_i32_0 : i32, i32
  }
  func.func @transform_7(%arg0: i32) -> (i32, i32) {
    %c0_i32 = arith.constant 0 : i32
    %c0_i32_0 = arith.constant 0 : i32
    %c0_i32_1 = arith.constant 0 : i32
    return %c0_i32, %c0_i32_0 : i32, i32
  }
  func.func @transform_8(%arg0: i32) -> (i32, i32) {
    %c0_i32 = arith.constant 0 : i32
    %c0_i32_0 = arith.constant 0 : i32
    %c0_i32_1 = arith.constant 0 : i32
    return %c0_i32, %c0_i32_0 : i32, i32
  }
  func.func @transform_9(%arg0: i32) -> (i32, i32) {
    %c0_i32 = arith.constant 0 : i32
    %c0_i32_0 = arith.constant 0 : i32
    %c0_i32_1 = arith.constant 0 : i32
    return %c0_i32, %c0_i32_0 : i32, i32
  }
  func.func @transform_10(%arg0: i32) -> (i32, i32) {
    %c0_i32 = arith.constant 0 : i32
    %c0_i32_0 = arith.constant 0 : i32
    %c0_i32_1 = arith.constant 0 : i32
    return %c0_i32, %c0_i32_0 : i32, i32
  }
  func.func @transform_11(%arg0: i32) -> (i32, i32, i32) {
    %c0_i32 = arith.constant 0 : i32
    %c0_i32_0 = arith.constant 0 : i32
    %c0_i32_1 = arith.constant 0 : i32
    return %arg0, %c0_i32, %c0_i32_0 : i32, i32, i32
  }
}

</mosaic_0001>

<bundles_post_ra>
// kernel: cvt_forward.1
= control target key start
LH: loop header
LB: loop body
LE: loop exit
PB: predicated region body
PF: predicated region fallthrough
CT: control target
= control target key end

     0   :  { %s3356_s0 = inlined_call_operand.vmem [shape: bf16[4,32,1024], index: 0, kind: input, shape index: {}]   ;;  %s3357_s1 = inlined_call_operand.vmem [shape: bf16[32,32], index: 1, kind: input, shape index: {}]   ;;  %s3358_s2 = inlined_call_operand.vmem [shape: bf16[16,32], index: 2, kind: input, shape index: {}]   ;;  %s3359_s3 = inlined_call_operand.vmem [shape: f32[16,256], index: 3, kind: input, shape index: {}]   ;;  %s3360_s4 = inlined_call_operand.vmem [shape: bf16[32,16], index: 4, kind: input, shape index: {}]   ;;  %s3361_s5 = inlined_call_operand.vmem [shape: bf16[64,32], index: 5, kind: input, shape index: {}]   ;;  %s3362_s6 = inlined_call_operand.vmem [shape: bf16[32,64], index: 6, kind: input, shape index: {}]   ;;  %s3363_s7 = inlined_call_operand.vmem [shape: f32[32,128], index: 7, kind: input, shape index: {}]   ;;  %s3364_s8 = inlined_call_operand.vmem [shape: f32[32,16], index: 8, kind: input, shape index: {}]   ;;  %s3365_s9 = inlined_call_operand.vmem [shape: f32[64,1], index: 9, kind: input, shape index: {}]   ;;  %s3366_s10 = inlined_call_operand.vmem [shape: f32[1,128], index: 10, kind: input, shape index: {}]   ;;  %s3367_s11 = inlined_call_operand.hbm [shape: f32[4,1,128], index: 11, kind: output, shape index: {}]  }
   0x1   :  { %3368 = sst [smem:[#allocation6_spill]] %s3356_s0 }
   0x2   :  { %16 = vsyncpa [#allocation3], 0 }
   0x3   :  { %18 = vsyncpa [#allocation3 + $0x1], 0  ;;  %s2565_s17 = smov 0   ;;  %s2567_s18 = smov 0  }
   0x4   :  { %s2569_s19 = smov 0   ;;  %s2571_s20 = smov 0  }
   0x5 LB: > { %s2586_s21 = sadd.s32 4294967295, %s2489_s20   ;;  %s2214_s22 = sadd.s32 4294967294, %s2489_s20   ;;  %s2489_s20 = sphi %s2571_s20, %s3381_s20   ;;  %s2485_s19 = sphi %s2569_s19, %s3380_s19   ;;  %s2481_s18 = sphi %s2567_s18, %s3379_s18   ;;  %s2477_s17 = sphi %s2565_s17, %s3378_s17  }
   0x6   : > { %s2590_s23 = sadd.s32 1, %s2489_s20   ;;  %s267_s24 = sadd.s32 1, %s2485_s19 }
   0x7   : > { %s264_s25 = ssub.s32 %s2489_s20, %s2590_s23  ;;  %p277_p0 = scmp.ne.s32.totalorder %s2485_s19, %s2481_s18 }
   0x8   : > { %p265_p1 = scmp.eq.s32.totalorder %s264_s25, 0  ;;  %p278_p2 = scmp.eq.s32.totalorder %s2586_s21, 3 }
   0x9   : > { %p283_p3 = scmp.ne.s32.totalorder %s2481_s18, %s2477_s17  ;;  %p284_p4 = scmp.eq.s32.totalorder %s2214_s22, 3 }
   0xa   : > { %s2601_s26 = scalar_select %p265_p1, %s2485_s19, %s267_s24  }
   0xb   : > { %p2603_p5 = por %p278_p2, %p277_p0  ;;  %p2607_p6 = por %p284_p4, %p283_p3 }
   0xc   : > { %3369 = sst [smem:[#allocation5_spill]] %s2601_s26  ;;  %p2217_p7 = scmp.ge.s32.totalorder %s2489_s20, 1 }
   0xd   : > { %p340_p8 = scmp.lt.s32.totalorder %s2489_s20, 5 }
   0xf   : > { %p341_p9 = pnand %p2217_p7, %p340_p8 }
  0x10   : > { %p379_p10 = scmp.lt.s32.totalorder (!%p341_p9), %s2586_s21, 3  ;;  %s3372_s0 = sld [smem:[#allocation6_spill]] (!%p341_p9) }
  0x11   : > { %344 = sbr.rel (%p341_p9) target bundleno = 2416 (0x970), region = 64  ;;  %s2493_s15 = smov (!%p341_p9), 1  }
  0x12   : > { %s2494_s16 = smov (!%p341_p9), 16   ;;  %s377_s12 = sand.u32 (!%p341_p9), 1, %s2481_s18  }
  0x13   : > { %s378_s14 = scalar_lea.vmem (!%p341_p9), [#allocation2], %s377_s12  ;;  %s2147_s25 = scalar_lea.sflag (!%p341_p9), [#allocation3], %s377_s12 }
  0x16   : > { %v2491_v0 = vmov 0   ;;  %s380_s29 = scalar_select %p379_p10, %s2586_s21, 3  ;;  %v2621_v1 = vld [vmem:[%s3364_s8] sm:$0xff]  ;;  %v2628_v2 = vld [vmem:[%s3364_s8 + $0x8] sm:$0xff]  ;;  %v2633_v3 = vld [vmem:[%s3364_s8 + $0x10] sm:$0xff]  ;;  %vm561_vm0 = vcmask 261120  }
  0x17   : > { %600 = vmatprep.mubr.bf16.mxu0 %v2491_v0  ;;  %653 = vmatprep.mubr.bf16.mxu1 %v2491_v0  ;;  %v2639_v4 = vld [vmem:[%s3364_s8 + $0x18] sm:$0xff]  ;;  %v2348_v25 = vld [vmem:[%s3357_s1] sm:$0xff]   ;;  %v2349_v38 = vld [vmem:[%s3357_s1 + $0x8] sm:$0xff]   ;;  %v2492_v39 = vmov 1   ;;  %vm860_vm1 = vcmask 7168   ;;  %vm1030_vm4 = vcmask 138240  }
  0x18   : > { %2320 = vset.pattern.permute.xlu0 %v2491_v0  ;;  %2321 = vset.pattern.permute.xlu1 %v2491_v0  ;;  %s2267_s22 = sshll.u32 %s380_s29, 7  ;;  %vm957_vm5 = vcmask 130048   ;;  %vm1821_vm6 = vcmask 523264   ;;  %vm2083_vm7 = vcmask 1040384  }
  0x19   : > { %453 = vperm.xlu0 %2320, %v2621_v1   ;;  %463 = vperm.xlu1 %2321, %v2633_v3   ;;  %s2644_s26 = scalar_lea.vmem %s3372_s0, %s2267_s22  ;;  %s2495_s22 = smov 17  }
  0x1a   : > { %v443_v5 = vld [vmem:[%s2644_s26 + $0x40] sm:$0xff]  ;;  %v444_v7 = vld [vmem:[%s2644_s26 + $0x48] sm:$0xff]  ;;  %v445_v18 = vld [vmem:[%s2644_s26 + $0x50] sm:$0xff]  ;;  %s2504_s0 = smov [#allocation2]  }
  0x1b   : > { %v447_v6 = vld [vmem:[%s2644_s26 + $0x60] sm:$0xff]  ;;  %v448_v9 = vld [vmem:[%s2644_s26 + $0x68] sm:$0xff]  ;;  %v449_v20 = vld [vmem:[%s2644_s26 + $0x70] sm:$0xff]  ;;  %s2433_s29 = sshll.u32 %s2504_s0, 4  ;;  %s2434_s29 = int_to_ptr.vmem [resolvable:$false] %s2433_s29 }
  0x1c   : > { %v2231_v8 = vcombine.high %v443_v5, %v447_v6  ;;  %v2230_v10 = vcombine.low %v443_v5, %v447_v6  ;;  %v435_v11 = vld [vmem:[%s2644_s26] sm:$0xff]  ;;  %v2233_v13 = vcombine.high %v444_v7, %v448_v9  ;;  %v2232_v14 = vcombine.low %v444_v7, %v448_v9  ;;  %v436_v16 = vld [vmem:[%s2644_s26 + $0x8] sm:$0xff]  ;;  %v446_v21 = vld [vmem:[%s2644_s26 + $0x58] sm:$0xff] }
  0x1d   : > { %v439_v12 = vld [vmem:[%s2644_s26 + $0x20] sm:$0xff]  ;;  %458 = vperm.xlu0 %2320, %v2628_v2   ;;  %v440_v17 = vld [vmem:[%s2644_s26 + $0x28] sm:$0xff]  ;;  %468 = vperm.xlu1 %2321, %v2639_v4   ;;  %v450_v22 = vld [vmem:[%s2644_s26 + $0x78] sm:$0xff]  ;;  %v2235_v26 = vcombine.high %v445_v18, %v449_v20  ;;  %v2234_v32 = vcombine.low %v445_v18, %v449_v20 }
  0x1e   : > { %v2223_v15 = vcombine.high %v435_v11, %v439_v12  ;;  %580 = vmatprep.subr.bf16.mxu0 %v2231_v8  ;;  %v2225_v19 = vcombine.high %v436_v16, %v440_v17  ;;  %633 = vmatprep.subr.bf16.mxu1 %v2233_v13  ;;  %v2222_v23 = vcombine.low %v435_v11, %v439_v12  ;;  %v437_v27 = vld [vmem:[%s2644_s26 + $0x10] sm:$0xff]  ;;  %v438_v30 = vld [vmem:[%s2644_s26 + $0x18] sm:$0xff] }
  0x1f   : > { %581 = vmatpush1.bf16.msra.mxu0 %v2230_v10  ;;  %634 = vmatpush1.bf16.msra.mxu1 %v2232_v14  ;;  %v2224_v24 = vcombine.low %v436_v16, %v440_v17  ;;  %v441_v28 = vld [vmem:[%s2644_s26 + $0x30] sm:$0xff]  ;;  %v2237_v29 = vcombine.high %v446_v21, %v450_v22  ;;  %v442_v31 = vld [vmem:[%s2644_s26 + $0x38] sm:$0xff]  ;;  %v2236_v33 = vcombine.low %v446_v21, %v450_v22  ;;  %s2264_s26 = sshll.u32 %s2586_s21, 4  ;;  %s2435_s21 = scalar_lea.vmem %s2434_s29, 32 }
  0x20   : > { %582 = vmatprep.subr.bf16.mxu0 %v2223_v15  ;;  %635 = vmatprep.subr.bf16.mxu1 %v2225_v19  ;;  %v2227_v34 = vcombine.high %v437_v27, %v441_v28  ;;  %v2229_v35 = vcombine.high %v438_v30, %v442_v31  ;;  %v2226_v36 = vcombine.low %v437_v27, %v441_v28  ;;  %s2157_s24 = scalar_lea.hbm %s3367_s11, %s2264_s26 }
  0x21   : > { %v2228_v37 = vcombine.low %v438_v30, %v442_v31  ;;  %2323 = vset.pattern.permute.xlu1 %v2492_v39  ;;  %2322 = vset.pattern.permute.xlu0 %v2492_v39 }
  0x23   : > { %583 = vmatpush1.bf16.msra.mxu0 %v2222_v23  ;;  %636 = vmatpush1.bf16.msra.mxu1 %v2224_v24 }
  0x24   : > { %686 = vmatprep.subr.bf16.mxu0 %v2235_v26  ;;  %739 = vmatprep.subr.bf16.mxu1 %v2237_v29 }
  0x26   : > { %2238 = vmatmul.mubr.msk.bf16.vlgmr.msra.gmra.mxu0 %vm561_vm0, %v2348_v25  ;;  %2240 = vmatmul.mubr.msk.bf16.vlgmr.msra.gmra.mxu1 %vm561_vm0, %v2348_v25 }
  0x27   : > { %610 = vmatprep.mubr.bf16.mxu0 %v2491_v0  ;;  %663 = vmatprep.mubr.bf16.mxu1 %v2491_v0 }
  0x28   : > { %687 = vmatpush1.bf16.msra.mxu0 %v2234_v32  ;;  %740 = vmatpush1.bf16.msra.mxu1 %v2236_v33 }
  0x29   : > { %688 = vmatprep.subr.bf16.mxu0 %v2227_v34  ;;  %741 = vmatprep.subr.bf16.mxu1 %v2229_v35 }
  0x2c   : > { %689 = vmatpush1.bf16.msra.mxu0 %v2226_v36  ;;  %742 = vmatpush1.bf16.msra.mxu1 %v2228_v37 }
  0x2e   : > { %2239 = vmatmul.mubr.msk.bf16.gmra.mxu0 %vm561_vm0, %v2349_v38  ;;  %2241 = vmatmul.mubr.msk.bf16.gmra.mxu1 %vm561_vm0, %v2349_v38 }
  0x2f   : > { %706 = vmatprep.mubr.bf16.mxu0 %v2491_v0  ;;  %759 = vmatprep.mubr.bf16.mxu1 %v2491_v0 }
  0x36   : > { %2242 = vmatmul.mubr.msk.bf16.vlgmr.msra.gmra.mxu0 %vm561_vm0, %v2348_v25  ;;  %2244 = vmatmul.mubr.msk.bf16.vlgmr.msra.gmra.mxu1 %vm561_vm0, %v2348_v25 }
  0x37   : > { %716 = vmatprep.mubr.bf16.mxu0 %v2491_v0  ;;  %769 = vmatprep.mubr.bf16.mxu1 %v2491_v0 }
  0x3e   : > { %2243 = vmatmul.mubr.msk.bf16.gmra.mxu0 %vm561_vm0, %v2349_v38  ;;  %2245 = vmatmul.mubr.msk.bf16.gmra.mxu1 %vm561_vm0, %v2349_v38 }
  0x3f   : > { %1246 = vmatprep.mubr.bf16.mxu0 %v2491_v0  ;;  %1359 = vmatprep.mubr.bf16.mxu1 %v2491_v0 }
  0x94   : > { %v2688_v40 = vpop.permute.xlu0 %453  ;;  %v2701_v59 = vpop.permute.xlu1 %463 }
  0x98   : > { %v2693_v50 = vpop.permute.xlu0 %458  ;;  %v2716_v21 = vpop.permute.xlu1 %468 }
  0xe6   : > { %v602_v41 = vpop.f32.mrf.mxu0  ;;  %v655_v43 = vpop.f32.mrf.mxu1 }
  0xe7   : > { %v603_v42 = vadd.f32 %v602_v41, %v2688_v40  ;;  %v656_v44 = vadd.f32 %v655_v43, %v2688_v40 }
  0xe8   : > { %v604_v45 = vpop.f32.mrf.mxu0  ;;  %v657_v48 = vpop.f32.mrf.mxu1 }
  0xe9   : > { %v780_v46 = vmax.f32 %v603_v42, 0.0  ;;  %v605_v47 = vadd.f32 %v604_v45, %v2688_v40  ;;  %v782_v49 = vmax.f32 %v656_v44, 0.0  ;;  %v658_v51 = vadd.f32 %v657_v48, %v2688_v40 }
  0xea   : > { %v606_v52 = vpop.f32.mrf.mxu0  ;;  %v659_v55 = vpop.f32.mrf.mxu1 }
  0xeb   : > { %v781_v53 = vmax.f32 %v605_v47, 0.0  ;;  %v607_v54 = vadd.f32 %v606_v52, %v2693_v50  ;;  %v2697_v56 = vmax.f32 %v780_v46, %v782_v49  ;;  %v783_v57 = vmax.f32 %v658_v51, 0.0  ;;  %844 = vrot.lane.b32.xlu0 %v782_v49, %s2493_s15 }
  0xec   : > { %v660_v58 = vadd.f32 %v659_v55, %v2693_v50  ;;  %v608_v60 = vpop.f32.mrf.mxu0  ;;  %v661_v63 = vpop.f32.mrf.mxu1 }
  0xed   : > { %v788_v61 = vmax.f32 %v607_v54, 0.0  ;;  %v609_v62 = vadd.f32 %v608_v60, %v2693_v50  ;;  %v2704_v5 = vmax.f32 %v781_v53, %v783_v57  ;;  %v662_v7 = vadd.f32 %v661_v63, %v2693_v50  ;;  %846 = vrot.lane.b32.xlu1 %v783_v57, %s2493_s15 }
  0xee   : > { %v790_v6 = vmax.f32 %v660_v58, 0.0  ;;  %v612_v8 = vpop.f32.mrf.mxu0  ;;  %v665_v11 = vpop.f32.mrf.mxu1 }
  0xef   : > { %v789_v9 = vmax.f32 %v609_v62, 0.0  ;;  %v613_v10 = vadd.f32 %v612_v8, %v2701_v59  ;;  %v791_v13 = vmax.f32 %v662_v7, 0.0  ;;  %v666_v14 = vadd.f32 %v665_v11, %v2701_v59 }
  0xf0   : > { %v2709_v12 = vmax.f32 %v788_v61, %v790_v6  ;;  %848 = vrot.lane.b32.xlu0 %v790_v6, %s2493_s15  ;;  %v614_v15 = vpop.f32.mrf.mxu0  ;;  %v667_v18 = vpop.f32.mrf.mxu1 }
  0xf1   : > { %v796_v16 = vmax.f32 %v613_v10, 0.0  ;;  %v615_v17 = vadd.f32 %v614_v15, %v2701_v59  ;;  %v2714_v19 = vmax.f32 %v789_v9, %v791_v13  ;;  %v798_v20 = vmax.f32 %v666_v14, 0.0  ;;  %850 = vrot.lane.b32.xlu1 %v791_v13, %s2493_s15 }
  0xf2   : > { %v668_v22 = vadd.f32 %v667_v18, %v2701_v59  ;;  %v616_v23 = vpop.f32.mrf.mxu0  ;;  %v669_v26 = vpop.f32.mrf.mxu1 }
  0xf3   : > { %v797_v24 = vmax.f32 %v615_v17, 0.0  ;;  %v617_v25 = vadd.f32 %v616_v23, %v2716_v21  ;;  %v2721_v27 = vmax.f32 %v796_v16, %v798_v20  ;;  %v670_v29 = vadd.f32 %v669_v26, %v2716_v21 }
  0xf4   : > { %v799_v28 = vmax.f32 %v668_v22, 0.0  ;;  %852 = vrot.lane.b32.xlu0 %v798_v20, %s2493_s15  ;;  %v618_v30 = vpop.f32.mrf.mxu0  ;;  %v671_v33 = vpop.f32.mrf.mxu1 }
  0xf5   : > { %v804_v31 = vmax.f32 %v617_v25, 0.0  ;;  %v619_v32 = vadd.f32 %v618_v30, %v2716_v21  ;;  %v806_v35 = vmax.f32 %v670_v29, 0.0  ;;  %v672_v36 = vadd.f32 %v671_v33, %v2716_v21 }
  0xf6   : > { %v2726_v34 = vmax.f32 %v797_v24, %v799_v28  ;;  %854 = vrot.lane.b32.xlu1 %v799_v28, %s2493_s15  ;;  %v708_v37 = vpop.f32.mrf.mxu0  ;;  %v761_v42 = vpop.f32.mrf.mxu1 }
  0xf7   : > { %v805_v38 = vmax.f32 %v619_v32, 0.0  ;;  %v709_v41 = vadd.f32 %v708_v37, %v2688_v40  ;;  %v2731_v43 = vmax.f32 %v804_v31, %v806_v35  ;;  %v807_v44 = vmax.f32 %v672_v36, 0.0 }
  0xf8   : > { %v762_v45 = vadd.f32 %v761_v42, %v2688_v40  ;;  %856 = vrot.lane.b32.xlu0 %v806_v35, %s2493_s15  ;;  %v710_v46 = vpop.f32.mrf.mxu0  ;;  %v763_v49 = vpop.f32.mrf.mxu1 }
  0xf9   : > { %v784_v47 = vmax.f32 %v709_v41, 0.0  ;;  %v711_v48 = vadd.f32 %v710_v46, %v2688_v40  ;;  %v2736_v51 = vmax.f32 %v805_v38, %v807_v44  ;;  %v764_v53 = vadd.f32 %v763_v49, %v2688_v40 }
  0xfa   : > { %v786_v52 = vmax.f32 %v762_v45, 0.0  ;;  %858 = vrot.lane.b32.xlu1 %v807_v44, %s2493_s15  ;;  %v712_v54 = vpop.f32.mrf.mxu0  ;;  %v765_v58 = vpop.f32.mrf.mxu1 }
  0xfb   : > { %v785_v55 = vmax.f32 %v711_v48, 0.0  ;;  %v2741_v57 = vadd.f32 %v712_v54, %v2693_v50  ;;  %v787_v61 = vmax.f32 %v764_v53, 0.0  ;;  %v766_v62 = vadd.f32 %v765_v58, %v2693_v50 }
  0xfc   : > { %v2743_v60 = vmax.f32 %v784_v47, %v786_v52  ;;  %885 = vrot.lane.b32.xlu0 %v786_v52, %s2493_s15  ;;  %v714_v63 = vpop.f32.mrf.mxu0  ;;  %v767_v7 = vpop.f32.mrf.mxu1 }
  0xfd   : > { %v792_v6 = vmax.f32 %v2741_v57, 0.0  ;;  %v715_v40 = vadd.f32 %v714_v63, %v2693_v50  ;;  %v2749_v8 = vmax.f32 %v785_v55, %v787_v61  ;;  %v794_v9 = vmax.f32 %v766_v62, 0.0 }
  0xfe   : > { %v768_v10 = vadd.f32 %v767_v7, %v2693_v50  ;;  %887 = vrot.lane.b32.xlu1 %v787_v61, %s2493_s15  ;;  %v718_v11 = vpop.f32.mrf.mxu0  ;;  %v828_v13 = vmax.f32 %v2697_v56, %v2743_v60  ;;  %v771_v16 = vpop.f32.mrf.mxu1 }
  0xff   : > { %v793_v14 = vmax.f32 %v715_v40, 0.0  ;;  %v719_v15 = vadd.f32 %v718_v11, %v2701_v59  ;;  %v2756_v17 = vmax.f32 %v792_v6, %v794_v9  ;;  %v772_v20 = vadd.f32 %v771_v16, %v2701_v59 }
 0x100   : > { %v795_v18 = vmax.f32 %v768_v10, 0.0  ;;  %941 = vrot.lane.b32.xlu0 %v784_v47, %s2494_s16  ;;  %v720_v22 = vpop.f32.mrf.mxu0  ;;  %v829_v50 = vmax.f32 %v2704_v5, %v2749_v8  ;;  %v773_v25 = vpop.f32.mrf.mxu1 }
 0x101   : > { %v800_v23 = vmax.f32 %v719_v15, 0.0  ;;  %v721_v24 = vadd.f32 %v720_v22, %v2701_v59  ;;  %v802_v28 = vmax.f32 %v772_v20, 0.0  ;;  %v774_v29 = vadd.f32 %v773_v25, %v2701_v59 }
 0x102   : > { %v2763_v26 = vmax.f32 %v793_v14, %v795_v18  ;;  %943 = vrot.lane.b32.xlu1 %v785_v55, %s2494_s16  ;;  %v722_v30 = vpop.f32.mrf.mxu0  ;;  %v830_v31 = vmax.f32 %v2709_v12, %v2756_v17  ;;  %v775_v35 = vpop.f32.mrf.mxu1 }
 0x103   : > { %v801_v32 = vmax.f32 %v721_v24, 0.0  ;;  %v723_v33 = vadd.f32 %v722_v30, %v2716_v21  ;;  %v2770_v36 = vmax.f32 %v800_v23, %v802_v28  ;;  %v803_v37 = vmax.f32 %v774_v29, 0.0 }
 0x104   : > { %v776_v38 = vadd.f32 %v775_v35, %v2716_v21  ;;  %974 = vrot.lane.b32.xlu0 %v786_v52, %s2494_s16  ;;  %v724_v41 = vpop.f32.mrf.mxu0  ;;  %v831_v59 = vmax.f32 %v2714_v19, %v2763_v26  ;;  %v777_v45 = vpop.f32.mrf.mxu1 }
 0x105   : > { %v808_v42 = vmax.f32 %v723_v33, 0.0  ;;  %v725_v44 = vadd.f32 %v724_v41, %v2716_v21  ;;  %v2777_v46 = vmax.f32 %v801_v32, %v803_v37  ;;  %v778_v48 = vadd.f32 %v777_v45, %v2716_v21 }
 0x106   : > { %v810_v47 = vmax.f32 %v776_v38, 0.0  ;;  %976 = vrot.lane.b32.xlu1 %v787_v61, %s2494_s16  ;;  %v832_v49 = vmax.f32 %v2721_v27, %v2770_v36 }
 0x107   : > { %v809_v53 = vmax.f32 %v725_v44, 0.0  ;;  %v811_v55 = vmax.f32 %v778_v48, 0.0  ;;  %v833_v57 = vmax.f32 %v2726_v34, %v2777_v46 }
 0x108   : > { %v2783_v54 = vmax.f32 %v808_v42, %v810_v47  ;;  %1014 = vrot.lane.b32.xlu0 %v786_v52, %s2495_s22  ;;  %v2496_v52 = vmov 2  }
 0x109   : > { %v2787_v58 = vmax.f32 %v809_v53, %v811_v55 }
 0x10a   : > { %1016 = vrot.lane.b32.xlu1 %v787_v61, %s2495_s22  ;;  %v834_v21 = vmax.f32 %v2731_v43, %v2783_v54 }
 0x10b   : > { %v835_v62 = vmax.f32 %v2736_v51, %v2787_v58 }
 0x10c   : > { %889 = vrot.lane.b32.xlu0 %v794_v9, %s2493_s15 }
 0x10e   : > { %891 = vrot.lane.b32.xlu1 %v795_v18, %s2493_s15 }
 0x110   : > { %945 = vrot.lane.b32.xlu0 %v792_v6, %s2494_s16  ;;  %v428_v6 = vlaneseq }
 0x112   : > { %947 = vrot.lane.b32.xlu1 %v793_v14, %s2494_s16 }
 0x114   : > { %978 = vrot.lane.b32.xlu0 %v794_v9, %s2494_s16 }
 0x116   : > { %980 = vrot.lane.b32.xlu1 %v795_v18, %s2494_s16 }
 0x118   : > { %1018 = vrot.lane.b32.xlu0 %v794_v9, %s2495_s22 }
 0x11a   : > { %1020 = vrot.lane.b32.xlu1 %v795_v18, %s2495_s22 }
 0x11c   : > { %893 = vrot.lane.b32.xlu0 %v802_v28, %s2493_s15 }
 0x11e   : > { %895 = vrot.lane.b32.xlu1 %v803_v37, %s2493_s15 }
 0x120   : > { %949 = vrot.lane.b32.xlu0 %v800_v23, %s2494_s16 }
 0x122   : > { %951 = vrot.lane.b32.xlu1 %v801_v32, %s2494_s16 }
 0x124   : > { %982 = vrot.lane.b32.xlu0 %v802_v28, %s2494_s16 }
 0x126   : > { %984 = vrot.lane.b32.xlu1 %v803_v37, %s2494_s16 }
 0x128   : > { %1022 = vrot.lane.b32.xlu0 %v802_v28, %s2495_s22 }
 0x12a   : > { %1024 = vrot.lane.b32.xlu1 %v803_v37, %s2495_s22 }
 0x12c   : > { %897 = vrot.lane.b32.xlu0 %v810_v47, %s2493_s15 }
 0x12e   : > { %899 = vrot.lane.b32.xlu1 %v811_v55, %s2493_s15  ;;  %s2159_s15 = sshll.u32 %s378_s14, 4  ;;  %s2160_s15 = int_to_ptr.vmem [resolvable:$true] %s2159_s15 }
 0x12f   : > { %s2429_s30 = scalar_lea.vmem %s2160_s15, 16  ;;  %p2436_p0 = scmp.lt.s32.totalorder %s2160_s15, %s2434_s29 }
 0x130   : > { %953 = vrot.lane.b32.xlu0 %v808_v42, %s2494_s16  ;;  %p2430_p11 = scmp.ne.s32.totalorder %s2160_s15, %s2429_s30  ;;  %p2437_p1 = scmp.lt.s32.totalorder %s2435_s21, %s2429_s30 }
 0x132   : > { %955 = vrot.lane.b32.xlu1 %v809_v53, %s2494_s16  ;;  %p2431_p12 = pnand %p2430_p11, %p2603_p5  ;;  %p2438_p2 = por %p2437_p1, %p2436_p0 }
 0x134   : > { %986 = vrot.lane.b32.xlu0 %v810_v47, %s2494_s16  ;;  %p2432_p13 = pneg %p2431_p12 }
 0x136   : > { %988 = vrot.lane.b32.xlu1 %v811_v55, %s2494_s16  ;;  %p2439_p3 = pnand %p2438_p2, %p2432_p13 }
 0x138   : > { %1026 = vrot.lane.b32.xlu0 %v810_v47, %s2495_s22 }
 0x13a   : > { %1028 = vrot.lane.b32.xlu1 %v811_v55, %s2495_s22 }
 0x13c   : > { %1163 = vperm.xlu0 %2322, %v2633_v3  }
 0x13e   : > { %1167 = vperm.xlu1 %2323, %v2639_v4  }
 0x140   : > { %2325 = vset.pattern.permute.xlu0 %v2496_v52 }
 0x141   : > { %1191 = vperm.xlu0 %2325, %v2639_v4   ;;  %v429_v4 = vand.u32 127, %v428_v6 }
 0x142   : > { %2324 = vset.pattern.permute.xlu1 %v2496_v52 }
 0x143   : > { %1187 = vperm.xlu1 %2324, %v2633_v3  }
 0x145   : > { %1179 = vperm.xlu0 %2325, %v2621_v1  }
 0x147   : > { %2326 = vset.pattern.permute.xlu1 %v2492_v39  ;;  %v430_v39 = vadd.s32 128, %v429_v4 }
 0x148   : > { %1155 = vperm.xlu1 %2326, %v2621_v1   ;;  %v431_v1 = vand.u32 15, %v429_v4 }
 0x149   : > { %v432_v15 = vand.u32 15, %v430_v39 }
 0x14a   : > { %vm2827_vm2 = vcmp.ne.s32.totalorder %v431_v1, 0 }
 0x14b   : > { %vm2833_vm3 = vcmp.ne.s32.totalorder %v432_v15, 0 }
 0x14c   : > { %1159 = vperm.xlu1 %2326, %v2628_v2  }
 0x150   : > { %2327 = vset.pattern.permute.xlu1 %v2496_v52 }
 0x151   : > { %1183 = vperm.xlu1 %2327, %v2628_v2  }
 0x15d   : > { %v845_v61 = vpop.permute.xlu0 %844 }
 0x15e   : > { %v873_v16 = vsel %vm860_vm1, -1e+30, %v845_v61 }
 0x15f   : > { %v847_v63 = vpop.permute.xlu1 %846 }
 0x160   : > { %v861_v24 = vsel %vm860_vm1, %v845_v61, %v847_v63 }
 0x162   : > { %v849_v40 = vpop.permute.xlu0 %848 }
 0x163   : > { %v851_v7 = vpop.permute.xlu1 %850  ;;  %v874_v48 = vsel %vm860_vm1, -1e+30, %v849_v40 }
 0x164   : > { %v862_v53 = vsel %vm860_vm1, %v849_v40, %v851_v7 }
 0x166   : > { %v853_v9 = vpop.permute.xlu0 %852 }
 0x167   : > { %v875_v15 = vsel %vm860_vm1, -1e+30, %v853_v9 }
 0x168   : > { %v855_v3 = vpop.permute.xlu1 %854 }
 0x169   : > { %v863_v10 = vsel %vm860_vm1, %v853_v9, %v855_v3 }
 0x16a   : > { %v2822_v11 = vpop.permute.xlu0 %856 }
 0x16c   : > { %v2824_v14 = vpop.permute.xlu1 %858 }
 0x16e   : > { %v886_v2 = vpop.permute.xlu0 %885 }
 0x16f   : > { %v913_v20 = vsel %vm860_vm1, -1e+30, %v886_v2 }
 0x170   : > { %v917_v22 = vmax.f32 %v873_v16, %v913_v20  ;;  %v888_v23 = vpop.permute.xlu1 %887 }
 0x171   : > { %v901_v28 = vsel %vm860_vm1, %v886_v2, %v888_v23 }
 0x172   : > { %v925_v29 = vsel %vm2827_vm2, %v917_v22, -1e+30  ;;  %v918_v30 = vmax.f32 %v861_v24, %v901_v28  ;;  %v942_v32 = vpop.permute.xlu0 %941 }
 0x173   : > { %v2843_v33 = vmax.f32 %v828_v13, %v925_v29 }
 0x174   : > { %v926_v35 = vsel %vm2833_vm3, %v918_v30, -1e+30  ;;  %v944_v37 = vpop.permute.xlu1 %943  ;;  %v970_v30 = vsel %vm957_vm5, -1e+30, %v942_v32 }
 0x175   : > { %v2850_v38 = vmax.f32 %v829_v50, %v926_v35  ;;  %v876_v35 = vsel %vm860_vm1, -1e+30, %v2822_v11 }
 0x176   : > { %v975_v41 = vpop.permute.xlu0 %974 }
 0x178   : > { %v977_v42 = vpop.permute.xlu1 %976 }
 0x17a   : > { %v1015_v44 = vpop.permute.xlu0 %1014 }
 0x17b   : > { %v1043_v27 = vsel %vm1030_vm4, -1e+30, %v1015_v44 }
 0x17c   : > { %v1017_v45 = vpop.permute.xlu1 %1016 }
 0x17d   : > { %v1031_v34 = vsel %vm1030_vm4, %v1015_v44, %v1017_v45 }
 0x17e   : > { %v890_v47 = vpop.permute.xlu0 %889 }
 0x17f   : > { %v914_v56 = vsel %vm860_vm1, -1e+30, %v890_v47 }
 0x180   : > { %v919_v60 = vmax.f32 %v874_v48, %v914_v56  ;;  %v892_v13 = vpop.permute.xlu1 %891  ;;  %v1047_v56 = vsel %vm2827_vm2, %v1043_v27, -1e+30 }
 0x181   : > { %v902_v55 = vsel %vm860_vm1, %v890_v47, %v892_v13  ;;  %v958_v47 = vsel %vm957_vm5, %v942_v32, %v944_v37  ;;  %v1048_v13 = vsel %vm2833_vm3, %v1031_v34, -1e+30 }
 0x182   : > { %v927_v5 = vsel %vm2827_vm2, %v919_v60, -1e+30  ;;  %v920_v8 = vmax.f32 %v862_v53, %v902_v55  ;;  %v946_v50 = vpop.permute.xlu0 %945 }
 0x183   : > { %v2861_v52 = vmax.f32 %v830_v31, %v927_v5 }
 0x184   : > { %v928_v61 = vsel %vm2833_vm3, %v920_v8, -1e+30  ;;  %v948_v63 = vpop.permute.xlu1 %947 }
 0x185   : > { %v2868_v40 = vmax.f32 %v831_v59, %v928_v61  ;;  %v959_v5 = vsel %vm957_vm5, %v946_v50, %v948_v63 }
 0x186   : > { %v979_v7 = vpop.permute.xlu0 %978 }
 0x187   : > { %v1003_v46 = vsel %vm957_vm5, -1e+30, %v979_v7 }
 0x188   : > { %v981_v4 = vpop.permute.xlu1 %980 }
 0x189   : > { %v991_v55 = vsel %vm957_vm5, %v979_v7, %v981_v4 }
 0x18a   : > { %v1019_v3 = vpop.permute.xlu0 %1018  ;;  %v1009_v7 = vmax.f32 %v959_v5, %v991_v55 }
 0x18b   : > { %v1044_v29 = vsel %vm1030_vm4, -1e+30, %v1019_v3 }
 0x18c   : > { %v1021_v39 = vpop.permute.xlu1 %1020 }
 0x18d   : > { %v1032_v44 = vsel %vm1030_vm4, %v1019_v3, %v1021_v39 }
 0x18e   : > { %v894_v1 = vpop.permute.xlu0 %893  ;;  %v1050_v3 = vsel %vm2833_vm3, %v1032_v44, -1e+30 }
 0x18f   : > { %v915_v12 = vsel %vm860_vm1, -1e+30, %v894_v1 }
 0x190   : > { %v921_v17 = vmax.f32 %v875_v15, %v915_v12  ;;  %v896_v31 = vpop.permute.xlu1 %895 }
 0x191   : > { %v903_v2 = vsel %vm860_vm1, %v894_v1, %v896_v31 }
 0x192   : > { %v929_v16 = vsel %vm2827_vm2, %v921_v17, -1e+30  ;;  %v922_v20 = vmax.f32 %v863_v10, %v903_v2  ;;  %v950_v19 = vpop.permute.xlu0 %949  ;;  %v1002_v10 = vsel %vm957_vm5, -1e+30, %v975_v41 }
 0x193   : > { %v2878_v26 = vmax.f32 %v832_v49, %v929_v16  ;;  %v990_v49 = vsel %vm957_vm5, %v975_v41, %v977_v42  ;;  %v1006_v48 = vmax.f32 %v970_v30, %v1002_v10  ;;  %v971_v41 = vsel %vm957_vm5, -1e+30, %v946_v50 }
 0x194   : > { %v930_v59 = vsel %vm2833_vm3, %v922_v20, -1e+30  ;;  %v952_v9 = vpop.permute.xlu1 %951  ;;  %v1007_v60 = vmax.f32 %v958_v47, %v990_v49  ;;  %v1049_v42 = vsel %vm2827_vm2, %v1044_v29, -1e+30  ;;  %v1008_v53 = vmax.f32 %v971_v41, %v1003_v46 }
 0x195   : > { %v2885_v22 = vmax.f32 %v833_v57, %v930_v59  ;;  %v1063_v37 = vmax.f32 %v1006_v48, %v1047_v56  ;;  %v972_v4 = vsel %vm957_vm5, -1e+30, %v950_v19  ;;  %v960_v31 = vsel %vm957_vm5, %v950_v19, %v952_v9 }
 0x196   : > { %v983_v23 = vpop.permute.xlu0 %982  ;;  %v1065_v15 = vmax.f32 %v1008_v53, %v1049_v42  ;;  %v1064_v17 = vmax.f32 %v1007_v60, %v1048_v13  ;;  %v1066_v59 = vmax.f32 %v1009_v7, %v1050_v3  ;;  %v864_v10 = vsel %vm860_vm1, %v2822_v11, %v2824_v14 }
 0x197   : > { %v1004_v8 = vsel %vm957_vm5, -1e+30, %v983_v23  ;;  %v2929_v30 = vmax.f32 %v2843_v33, %v1063_v37 }
 0x198   : > { %v985_v24 = vpop.permute.xlu1 %984  ;;  %v1010_v2 = vmax.f32 %v972_v4, %v1004_v8  ;;  %v2925_v27 = vmax.f32 %v2861_v52, %v1065_v15  ;;  %v2932_v34 = vmax.f32 %v2850_v38, %v1064_v17  ;;  %v2935_v46 = vmax.f32 %v2868_v40, %v1066_v59 }
 0x199   : > { %v992_v39 = vsel %vm957_vm5, %v983_v23, %v985_v24 }
 0x19a   : > { %v1023_v28 = vpop.permute.xlu0 %1022  ;;  %v1011_v23 = vmax.f32 %v960_v31, %v992_v39 }
 0x19b   : > { %v1045_v32 = vsel %vm1030_vm4, -1e+30, %v1023_v28 }
 0x19c   : > { %v1025_v36 = vpop.permute.xlu1 %1024  ;;  %v1051_v50 = vsel %vm2827_vm2, %v1045_v32, -1e+30 }
 0x19d   : > { %v1033_v61 = vsel %vm1030_vm4, %v1023_v28, %v1025_v36  ;;  %v1067_v36 = vmax.f32 %v1010_v2, %v1051_v50 }
 0x19e   : > { %v898_v57 = vpop.permute.xlu0 %897  ;;  %v1052_v16 = vsel %vm2833_vm3, %v1033_v61, -1e+30 }
 0x19f   : > { %v916_v12 = vsel %vm860_vm1, -1e+30, %v898_v57  ;;  %v1068_v49 = vmax.f32 %v1011_v23, %v1052_v16  ;;  %v2944_v33 = vmax.f32 %v2878_v26, %v1067_v36 }
 0x1a0   : > { %v900_v45 = vpop.permute.xlu1 %899  ;;  %v923_v24 = vmax.f32 %v876_v35, %v916_v12  ;;  %v1079_v35 = vadd.f32 %v2925_v27, %v2929_v30 }
 0x1a1   : > { %v904_v20 = vsel %vm860_vm1, %v898_v57, %v900_v45  ;;  %v2948_v40 = vmax.f32 %v2885_v22, %v1068_v49  ;;  %v1088_v22 = vadd.f32 %v2935_v46, %v2932_v34 }
 0x1a2   : > { %v954_v1 = vpop.permute.xlu0 %953  ;;  %v924_v19 = vmax.f32 %v864_v10, %v904_v20  ;;  %v931_v11 = vsel %vm2827_vm2, %v923_v24, -1e+30  ;;  %v1080_v53 = vadd.f32 %v1079_v35, %v2944_v33 }
 0x1a3   : > { %v973_v14 = vsel %vm957_vm5, -1e+30, %v954_v1  ;;  %v1061_v26 = vmax.f32 %v834_v21, %v931_v11  ;;  %v1089_v54 = vadd.f32 %v1088_v22, %v2948_v40 }
 0x1a4   : > { %v956_v63 = vpop.permute.xlu1 %955  ;;  %v932_v48 = vsel %vm2833_vm3, %v924_v19, -1e+30 }
 0x1a5   : > { %v961_v56 = vsel %vm957_vm5, %v954_v1, %v956_v63  ;;  %v1062_v18 = vmax.f32 %v835_v62, %v932_v48 }
 0x1a6   : > { %v987_v28 = vpop.permute.xlu0 %986 }
 0x1a7   : > { %v1005_v9 = vsel %vm957_vm5, -1e+30, %v987_v28 }
 0x1a8   : > { %v989_v29 = vpop.permute.xlu1 %988  ;;  %v1012_v47 = vmax.f32 %v973_v14, %v1005_v9 }
 0x1a9   : > { %v993_v52 = vsel %vm957_vm5, %v987_v28, %v989_v29 }
 0x1aa   : > { %v1027_v57 = vpop.permute.xlu0 %1026  ;;  %v1013_v42 = vmax.f32 %v961_v56, %v993_v52 }
 0x1ab   : > { %v1046_v38 = vsel %vm1030_vm4, -1e+30, %v1027_v57 }
 0x1ac   : > { %v1053_v60 = vsel %vm2827_vm2, %v1046_v38, -1e+30  ;;  %v1029_v41 = vpop.permute.xlu1 %1028 }
 0x1ad   : > { %v1069_v44 = vmax.f32 %v1012_v47, %v1053_v60  ;;  %v1034_v45 = vsel %vm1030_vm4, %v1027_v57, %v1029_v41 }
 0x1ae   : > { %v1054_v13 = vsel %vm2833_vm3, %v1034_v45, -1e+30 }
 0x1af   : > { %v2967_v55 = vmax.f32 %v1061_v26, %v1069_v44  ;;  %v1070_v43 = vmax.f32 %v1013_v42, %v1054_v13 }
 0x1b1   : > { %v1081_v21 = vadd.f32 %v1080_v53, %v2967_v55  ;;  %v2971_v32 = vmax.f32 %v1062_v18, %v1070_v43 }
 0x1b3   : > { %v1082_v37 = vrot.slane %v1081_v21, 4  ;;  %v1090_v5 = vadd.f32 %v1089_v54, %v2971_v32 }
 0x1b5   : > { %v1083_v25 = vadd.f32 %v1082_v37, %v1081_v21  ;;  %v1091_v8 = vrot.slane %v1090_v5, 4 }
 0x1b7   : > { %v1084_v61 = vrot.slane %v1083_v25, 2  ;;  %v1092_v1 = vadd.f32 %v1091_v8, %v1090_v5 }
 0x1b9   : > { %v1085_v15 = vadd.f32 %v1084_v61, %v1083_v25  ;;  %v1093_v3 = vrot.slane %v1092_v1, 2  ;;  %v1168_v21 = vpop.permute.xlu1 %1167 }
 0x1bb   : > { %v1086_v51 = vrot.slane %v1085_v15, 1  ;;  %v1094_v58 = vadd.f32 %v1093_v3, %v1092_v1 }
 0x1bd   : > { %v1087_v62 = vadd.f32 %v1086_v51, %v1085_v15  ;;  %v1095_v39 = vrot.slane %v1094_v58, 1  ;;  %v1164_v51 = vpop.permute.xlu0 %1163 }
 0x1be   : > { %v1188_v15 = vpop.permute.xlu1 %1187 }
 0x1bf   : > { %v1098_v12 = vmul.f32 0.05, %v1087_v62  ;;  %v1096_v17 = vadd.f32 %v1095_v39, %v1094_v58 }
 0x1c1   : > { %v1099_v7 = vmul.f32 0.05, %v1096_v17  ;;  %v1100_v4 = vsub.f32 %v2929_v30, %v1098_v12  ;;  %v1102_v50 = vsub.f32 %v2925_v27, %v1098_v12  ;;  %v1104_v63 = vsub.f32 %v2944_v33, %v1098_v12  ;;  %v1192_v62 = vpop.permute.xlu0 %1191 }
 0x1c2   : > { %v1106_v20 = vsub.f32 %v2967_v55, %v1098_v12  ;;  %v1134_v42 = vmul.f32 12.0, %v1098_v12 }
 0x1c3   : > { %v1101_v31 = vsub.f32 %v2932_v34, %v1099_v7  ;;  %v1103_v2 = vsub.f32 %v2935_v46, %v1099_v7  ;;  %v1105_v16 = vsub.f32 %v2948_v40, %v1099_v7  ;;  %v1108_v59 = vmul.f32 %v1100_v4, %v1100_v4  ;;  %v1156_v3 = vpop.permute.xlu1 %1155 }
 0x1c4   : > { %v1110_v23 = vmul.f32 %v1102_v50, %v1102_v50  ;;  %v1107_v24 = vsub.f32 %v2971_v32, %v1099_v7  ;;  %v1112_v36 = vmul.f32 %v1104_v63, %v1104_v63  ;;  %v1114_v29 = vmul.f32 %v1106_v20, %v1106_v20 }
 0x1c5   : > { %v1109_v28 = vmul.f32 %v1101_v31, %v1101_v31  ;;  %v1111_v10 = vmul.f32 %v1103_v2, %v1103_v2  ;;  %v1113_v19 = vmul.f32 %v1105_v16, %v1105_v16  ;;  %v1135_v45 = vmul.f32 12.0, %v1099_v7 }
 0x1c6   : > { %v1116_v49 = vadd.f32 %v1110_v23, %v1108_v59  ;;  %v1115_v14 = vmul.f32 %v1107_v24, %v1107_v24  ;;  %v1136_v18 = vmul.f32 %v1134_v42, %v1098_v12  ;;  %v424_v42 = vld [vmem:[%s3359_s3] sm:$0xff] }
 0x1c7   : > { %v1125_v9 = vadd.f32 %v1111_v10, %v1109_v28  ;;  %v1137_v54 = vmul.f32 %v1135_v45, %v1099_v7  ;;  %v1160_v58 = vpop.permute.xlu1 %1159  ;;  %v425_v45 = vld [vmem:[%s3359_s3 + $0x8] sm:$0xff] }
 0x1c8   : > { %v1117_v11 = vadd.f32 %v1116_v49, %v1112_v36 }
 0x1c9   : > { %v1126_v52 = vadd.f32 %v1125_v9, %v1113_v19 }
 0x1ca   : > { %v1118_v57 = vadd.f32 %v1117_v11, %v1114_v29 }
 0x1cb   : > { %v1127_v35 = vadd.f32 %v1126_v52, %v1115_v14 }
 0x1cc   : > { %v1119_v47 = vrot.slane %v1118_v57, 4 }
 0x1cd   : > { %v1128_v38 = vrot.slane %v1127_v35, 4 }
 0x1ce   : > { %v1120_v48 = vadd.f32 %v1119_v47, %v1118_v57 }
 0x1cf   : > { %v1129_v56 = vadd.f32 %v1128_v38, %v1127_v35 }
 0x1d0   : > { %v1121_v60 = vrot.slane %v1120_v48, 2 }
 0x1d1   : > { %v1130_v41 = vrot.slane %v1129_v56, 2 }
 0x1d2   : > { %v1122_v26 = vadd.f32 %v1121_v60, %v1120_v48  ;;  %v1184_v48 = vpop.permute.xlu1 %1183 }
 0x1d3   : > { %v1131_v44 = vadd.f32 %v1130_v41, %v1129_v56  ;;  %v1180_v56 = vpop.permute.xlu0 %1179 }
 0x1d4   : > { %v1123_v22 = vrot.slane %v1122_v26, 1 }
 0x1d5   : > { %v1132_v13 = vrot.slane %v1131_v44, 1 }
 0x1d6   : > { %v1124_v53 = vadd.f32 %v1123_v22, %v1122_v26  ;;  %v2350_v26 = vld [vmem:[%s3358_s2] sm:$0xff]  }
 0x1d7   : > { %v1133_v43 = vadd.f32 %v1132_v13, %v1131_v44 }
 0x1d8   : > { %v1138_v37 = vsub.f32 %v1124_v53, %v1136_v18  ;;  %v426_v18 = vld [vmem:[%s3359_s3 + $0x10] sm:$0xff] }
 0x1d9   : > { %v1139_v5 = vsub.f32 %v1133_v43, %v1137_v54  ;;  %v427_v54 = vld [vmem:[%s3359_s3 + $0x18] sm:$0xff] }
 0x1da   : > { %v1140_v25 = vmul.f32 0.05, %v1138_v37 }
 0x1db   : > { %v1141_v8 = vmul.f32 0.05, %v1139_v5 }
 0x1dc   : > { %v1142_v61 = vadd.f32 1e-05, %v1140_v25 }
 0x1dd   : > { %v1143_v1 = vadd.f32 1e-05, %v1141_v8 }
 0x1de   : > { %2359 = vrsqrt.f32 %v1142_v61 }
 0x1df   : > { %2361 = vrsqrt.f32 %v1143_v1 }
 0x1eb   : > { %v2360_v39 = vpop.eup %2359 }
 0x1ec   : > { %v2362_v17 = vpop.eup %2361  ;;  %v1152_v59 = vmul.f32 %v2360_v39, %v1106_v20  ;;  %v1146_v12 = vmul.f32 %v2360_v39, %v1100_v4  ;;  %v1150_v23 = vmul.f32 %v2360_v39, %v1104_v63  ;;  %v1148_v7 = vmul.f32 %v2360_v39, %v1102_v50 }
 0x1ed   : > { %v1153_v28 = vmul.f32 %v2362_v17, %v1107_v24  ;;  %v1147_v10 = vmul.f32 %v2362_v17, %v1101_v31  ;;  %v1151_v36 = vmul.f32 %v2362_v17, %v1105_v16  ;;  %v1149_v49 = vmul.f32 %v2362_v17, %v1103_v2 }
 0x1ee   : > { %v1176_v19 = vmul.f32 %v1168_v21, %v1152_v59  ;;  %v1174_v9 = vmul.f32 %v1164_v51, %v1150_v23  ;;  %v1170_v57 = vmul.f32 %v1156_v3, %v1146_v12  ;;  %v1172_v47 = vmul.f32 %v1160_v58, %v1148_v7 }
 0x1ef   : > { %v1177_v29 = vmul.f32 %v1168_v21, %v1153_v28  ;;  %v1171_v11 = vmul.f32 %v1156_v3, %v1147_v10  ;;  %v1175_v14 = vmul.f32 %v1164_v51, %v1151_v36  ;;  %v1173_v52 = vmul.f32 %v1160_v58, %v1149_v49 }
 0x1f0   : > { %v1198_v35 = vadd.f32 %v1188_v15, %v1174_v9  ;;  %v1200_v38 = vadd.f32 %v1192_v62, %v1176_v19  ;;  %v1196_v16 = vadd.f32 %v1184_v48, %v1172_v47  ;;  %v1194_v2 = vadd.f32 %v1180_v56, %v1170_v57  ;;  %v3002_v19 = vld [vmem:[%s3364_s8 + $0x10] sm:$0xff]  ;;  %v3008_v9 = vld [vmem:[%s3364_s8 + $0x18] sm:$0xff] }
 0x1f1   : > { %v1199_v20 = vadd.f32 %v1188_v15, %v1175_v14  ;;  %v1201_v4 = vadd.f32 %v1192_v62, %v1177_v29  ;;  %v1197_v63 = vadd.f32 %v1184_v48, %v1173_v52  ;;  %v1195_v50 = vadd.f32 %v1180_v56, %v1171_v11  ;;  %v3017_v11 = vld [vmem:[%s3364_s8] sm:$0xff]  ;;  %v3023_v14 = vld [vmem:[%s3364_s8 + $0x8] sm:$0xff] }
 0x1f2   : > { %v1204_v31 = vpack.c.bf16 %v1200_v38, %v1198_v35  ;;  %v1202_v41 = vpack.c.bf16 %v1196_v16, %v1194_v2  ;;  %v2497_v49 = vmov 3   ;;  %v2498_v29 = vmov 4  }
 0x1f3   : > { %v1205_v24 = vpack.c.bf16 %v1201_v4, %v1199_v20  ;;  %v1203_v60 = vpack.c.bf16 %v1197_v63, %v1195_v50  ;;  %2328 = vset.pattern.permute.xlu1 %v2497_v49  ;;  %2329 = vset.pattern.permute.xlu0 %v2497_v49 }
 0x1f5   : > { %1226 = vmatprep.subr.bf16.mxu0 %v1205_v24 }
 0x1f6   : > { %1227 = vmatpush1.bf16.msra.mxu0 %v1204_v31 }
 0x1f7   : > { %1228 = vmatprep.subr.bf16.mxu0 %v1203_v60 }
 0x1fa   : > { %1229 = vmatpush1.bf16.msra.mxu0 %v1202_v41 }
 0x1fd   : > { %2247 = vmatmul.mubr.msk.bf16.vlgmr.msra.gmra.mxu0 %vm561_vm0, %v2350_v26 }
 0x1fe   : > { %1618 = vmatprep.mubr.bf16.mxu0 %v2491_v0 }
 0x2bd   : > { %v1248_v44 = vpop.f32.mrf.mxu0 }
 0x2be   : > { %v1249_v13 = vadd.f32 %v1248_v44, %v424_v42 }
 0x2bf   : > { %v1250_v22 = vpop.f32.mrf.mxu0 }
 0x2c0   : > { %v1251_v53 = vadd.f32 %v1250_v22, %v425_v45 }
 0x2c1   : > { %v1252_v43 = vpop.f32.mrf.mxu0 }
 0x2c2   : > { %v1257_v21 = vmax.f32 %v1249_v13, %v1251_v53  ;;  %v1253_v5 = vadd.f32 %v1252_v43, %v426_v18 }
 0x2c3   : > { %v1254_v37 = vpop.f32.mrf.mxu0 }
 0x2c4   : > { %v1255_v25 = vadd.f32 %v1254_v37, %v427_v54  ;;  %1258 = vmax.xlane.f32.xlu0 %v1257_v21 }
 0x2c6   : > { %v1260_v8 = vmax.f32 %v1253_v5, %v1255_v25 }
 0x2c8   : > { %1261 = vmax.xlane.f32.xlu1 %v1260_v8 }
 0x2d9   : > { %1471 = vperm.xlu1 %2328, %v3002_v19  }
 0x2dd   : > { %2330 = vset.pattern.permute.xlu1 %v2498_v29 }
 0x2de   : > { %1495 = vperm.xlu1 %2330, %v3002_v19  }
 0x2e2   : > { %1499 = vperm.xlu1 %2330, %v3008_v9  }
 0x2e6   : > { %2331 = vset.pattern.permute.xlu1 %v2497_v49 }
 0x2e7   : > { %1463 = vperm.xlu1 %2331, %v3017_v11  }
 0x2eb   : > { %1467 = vperm.xlu1 %2331, %v3023_v14  }
 0x2ef   : > { %2332 = vset.pattern.permute.xlu1 %v2498_v29 }
 0x2f0   : > { %1487 = vperm.xlu1 %2332, %v3017_v11  }
 0x2f4   : > { %1491 = vperm.xlu1 %2332, %v3023_v14  }
 0x2f8   : > { %2333 = vset.pattern.permute.xlu1 %v2491_v0 }
 0x34d   : > { %v1259_v61 = vpop.xlane.xlu0 %1258 }
 0x34e   : > { %v1263_v1 = vsub.f32 %v1249_v13, %v1259_v61  ;;  %v1264_v15 = vsub.f32 %v1251_v53, %v1259_v61  ;;  %v2351_v61 = vld [vmem:[%s3360_s4] sm:$0xff]  }
 0x350   : > { %v1267_v3 = vmul.f32 1.442695, %v1263_v1  ;;  %v1269_v51 = vmul.f32 1.442695, %v1264_v15  ;;  %v2352_v1 = vld [vmem:[%s3360_s4 + $0x8] sm:$0xff]   ;;  %v395_v15 = vld [vmem:[%s3365_s9 + $0x30] sm:$0xff] }
 0x351   : > { %v1262_v58 = vpop.xlane.xlu1 %1261  ;;  %1546 = vperm.xlu1 %2333, %v395_v15  }
 0x352   : > { %2363 = vpow2.f32 %v1267_v3  ;;  %v1265_v62 = vsub.f32 %v1253_v5, %v1262_v58  ;;  %v1266_v39 = vsub.f32 %v1255_v25, %v1262_v58  ;;  %v393_v3 = vld [vmem:[%s3365_s9 + $0x20] sm:$0xff]  ;;  %v392_v58 = vld [vmem:[%s3365_s9 + $0x18] sm:$0xff] }
 0x353   : > { %2365 = vpow2.f32 %v1269_v51  ;;  %v396_v51 = vld [vmem:[%s3365_s9 + $0x38] sm:$0xff] }
 0x354   : > { %v1271_v17 = vmul.f32 1.442695, %v1265_v62  ;;  %v1273_v59 = vmul.f32 1.442695, %v1266_v39  ;;  %v394_v62 = vld [vmem:[%s3365_s9 + $0x28] sm:$0xff] }
 0x355   : > { %1551 = vperm.xlu1 %2333, %v396_v51   ;;  %v390_v39 = vld [vmem:[%s3365_s9 + $0x8] sm:$0xff] }
 0x356   : > { %2367 = vpow2.f32 %v1271_v17  ;;  %v391_v17 = vld [vmem:[%s3365_s9 + $0x10] sm:$0xff] }
 0x357   : > { %2369 = vpow2.f32 %v1273_v59 }
 0x359   : > { %1541 = vperm.xlu1 %2333, %v394_v62  }
 0x35d   : > { %1526 = vperm.xlu1 %2333, %v391_v17  }
 0x35f   : > { %v2364_v12 = vpop.eup %2363 }
 0x360   : > { %v2366_v23 = vpop.eup %2365 }
 0x361   : > { %v1275_v7 = vadd.f32 %v2366_v23, %v2364_v12 }
 0x363   : > { %v2368_v28 = vpop.eup %2367  ;;  %1276 = vadd.xlane.f32.xlu0 %v1275_v7 }
 0x364   : > { %v2370_v10 = vpop.eup %2369 }
 0x365   : > { %v1278_v36 = vadd.f32 %v2370_v10, %v2368_v28 }
 0x367   : > { %1279 = vadd.xlane.f32.xlu0 %v1278_v36 }
 0x37d   : > { %1475 = vperm.xlu0 %2329, %v3008_v9  }
 0x381   : > { %2334 = vset.pattern.permute.xlu0 %v2491_v0 }
 0x382   : > { %1536 = vperm.xlu0 %2334, %v393_v3  }
 0x386   : > { %1531 = vperm.xlu0 %2334, %v392_v58  }
 0x38a   : > { %1521 = vperm.xlu0 %2334, %v390_v39  }
 0x3ec   : > { %v1277_v52 = vpop.xlane.xlu0 %1276 }
 0x3ed   : > { %2371 = vrcp.f32 %v1277_v52 }
 0x3f0   : > { %v1280_v57 = vpop.xlane.xlu0 %1279 }
 0x3f1   : > { %2373 = vrcp.f32 %v1280_v57 }
 0x3fa   : > { %v2372_v35 = vpop.eup %2371 }
 0x3fb   : > { %v1284_v38 = vmul.f32 %v2372_v35, %v2366_v23  ;;  %v1283_v56 = vmul.f32 %v2372_v35, %v2364_v12  ;;  %v389_v12 = vld [vmem:[%s3365_s9] sm:$0xff] }
 0x3fc   : > { %1516 = vperm.xlu1 %2333, %v389_v12   ;;  %v1472_v12 = vpop.permute.xlu1 %1471 }
 0x3fe   : > { %v2374_v47 = vpop.eup %2373 }
 0x3ff   : > { %v1286_v48 = vmul.f32 %v2374_v47, %v2370_v10  ;;  %v1285_v20 = vmul.f32 %v2374_v47, %v2368_v28 }
 0x401   : > { %v1294_v4 = vadd.f32 %v1286_v48, %v1284_v38  ;;  %v1287_v63 = vadd.f32 %v1285_v20, %v1283_v56 }
 0x403   : > { %v1295_v50 = vrot.slane %v1294_v4, 4  ;;  %v1288_v24 = vrot.slane %v1287_v63, 4 }
 0x405   : > { %v1296_v31 = vadd.f32 %v1295_v50, %v1294_v4  ;;  %v1289_v16 = vadd.f32 %v1288_v24, %v1287_v63 }
 0x407   : > { %v1297_v2 = vrot.slane %v1296_v31, 2  ;;  %v1290_v60 = vrot.slane %v1289_v16, 2 }
 0x409   : > { %v1298_v41 = vadd.f32 %v1297_v2, %v1296_v31  ;;  %v1291_v26 = vadd.f32 %v1290_v60, %v1289_v16 }
 0x40b   : > { %v1299_v42 = vrot.slane %v1298_v41, 1  ;;  %v1292_v44 = vrot.slane %v1291_v26, 1 }
 0x40d   : > { %v1300_v45 = vadd.f32 %v1299_v42, %v1298_v41  ;;  %v1293_v22 = vadd.f32 %v1292_v44, %v1291_v26 }
 0x40f   : > { %v1302_v13 = vadd.f32 1e-09, %v1300_v45  ;;  %v1301_v53 = vadd.f32 1e-09, %v1293_v22 }
 0x411   : > { %2375 = vrcp.f32 %v1302_v13 }
 0x412   : > { %2377 = vrcp.f32 %v1301_v53 }
 0x41e   : > { %v2376_v18 = vpop.eup %2375 }
 0x41f   : > { %v2378_v43 = vpop.eup %2377  ;;  %v1306_v54 = vmul.f32 %v2376_v18, %v1284_v38  ;;  %v1308_v21 = vmul.f32 %v2376_v18, %v1286_v48 }
 0x420   : > { %v1304_v37 = vmul.f32 %v2378_v43, %v1283_v56  ;;  %v1307_v5 = vmul.f32 %v2378_v43, %v1285_v20 }
 0x421   : > { %v1310_v25 = vpack.c.bf16 %v1308_v21, %v1306_v54 }
 0x422   : > { %v1309_v8 = vpack.c.bf16 %v1307_v5, %v1304_v37 }
 0x423   : > { %1341 = vmatprep.subr.bf16.mxu1 %v1310_v25 }
 0x424   : > { %1342 = vmatpush1.bf16.msra.mxu1 %v1309_v8 }
 0x427   : > { %2250 = vmatmul.mubr.msk.bf16.vlgmr.msra.gmra.mxu1 %vm957_vm5, %v2351_v61 }
 0x428   : > { %1369 = vmatprep.mubr.bf16.mxu1 %v2491_v0 }
 0x42f   : > { %2251 = vmatmul.mubr.msk.bf16.gmra.mxu1 %vm957_vm5, %v2352_v1 }
 0x430   : > { %1860 = vmatprep.mubr.bf16.mxu1 %v2491_v0 }
 0x4e7   : > { %v1361_v59 = vpop.f32.mrf.mxu1 }
 0x4e8   : > { %v3067_v49 = vadd.f32 %v1361_v59, %v2929_v30 }
 0x4e9   : > { %v1363_v23 = vpop.f32.mrf.mxu1 }
 0x4ea   : > { %v3076_v35 = vadd.f32 %v1363_v23, %v2932_v34 }
 0x4eb   : > { %v1365_v7 = vpop.f32.mrf.mxu1 }
 0x4ec   : > { %v3064_v10 = vadd.f32 %v1365_v7, %v2925_v27 }
 0x4ed   : > { %v1367_v28 = vpop.f32.mrf.mxu1 }
 0x4ee   : > { %v3070_v29 = vadd.f32 %v1367_v28, %v2935_v46  ;;  %v1388_v47 = vadd.f32 %v3064_v10, %v3067_v49 }
 0x4ef   : > { %v1371_v36 = vpop.f32.mrf.mxu1 }
 0x4f0   : > { %v3073_v52 = vadd.f32 %v1371_v36, %v2944_v33  ;;  %v1397_v30 = vadd.f32 %v3070_v29, %v3076_v35 }
 0x4f1   : > { %v1373_v57 = vpop.f32.mrf.mxu1 }
 0x4f2   : > { %v3081_v27 = vadd.f32 %v1373_v57, %v2948_v40  ;;  %v1389_v46 = vadd.f32 %v1388_v47, %v3073_v52 }
 0x4f3   : > { %v1375_v38 = vpop.f32.mrf.mxu1 }
 0x4f4   : > { %v3087_v48 = vadd.f32 %v1375_v38, %v2967_v55  ;;  %v1398_v56 = vadd.f32 %v1397_v30, %v3081_v27 }
 0x4f5   : > { %v1377_v33 = vpop.f32.mrf.mxu1 }
 0x4f6   : > { %v1390_v34 = vadd.f32 %v1389_v46, %v3087_v48  ;;  %v3092_v20 = vadd.f32 %v1377_v33, %v2971_v32  ;;  %v1496_v46 = vpop.permute.xlu1 %1495 }
 0x4f8   : > { %v1391_v4 = vrot.slane %v1390_v34, 4  ;;  %v1399_v40 = vadd.f32 %v1398_v56, %v3092_v20 }
 0x4fa   : > { %v1392_v63 = vadd.f32 %v1391_v4, %v1390_v34  ;;  %v1400_v50 = vrot.slane %v1399_v40, 4 }
 0x4fc   : > { %v1393_v24 = vrot.slane %v1392_v63, 2  ;;  %v1401_v31 = vadd.f32 %v1400_v50, %v1399_v40 }
 0x4fe   : > { %v1394_v16 = vadd.f32 %v1393_v24, %v1392_v63  ;;  %v1402_v2 = vrot.slane %v1401_v31, 2 }
 0x500   : > { %v1395_v60 = vrot.slane %v1394_v16, 1  ;;  %v1403_v55 = vadd.f32 %v1402_v2, %v1401_v31 }
 0x502   : > { %v1396_v41 = vadd.f32 %v1395_v60, %v1394_v16  ;;  %v1404_v26 = vrot.slane %v1403_v55, 1  ;;  %v1500_v16 = vpop.permute.xlu1 %1499 }
 0x504   : > { %v1406_v42 = vmul.f32 0.05, %v1396_v41  ;;  %v1405_v44 = vadd.f32 %v1404_v26, %v1403_v55 }
 0x506   : > { %v1407_v45 = vmul.f32 0.05, %v1405_v44  ;;  %v1408_v22 = vsub.f32 %v3067_v49, %v1406_v42  ;;  %v1410_v32 = vsub.f32 %v3064_v10, %v1406_v42  ;;  %v1412_v13 = vsub.f32 %v3073_v52, %v1406_v42  ;;  %v1464_v44 = vpop.permute.xlu1 %1463 }
 0x507   : > { %v1414_v43 = vsub.f32 %v3087_v48, %v1406_v42  ;;  %v1442_v30 = vmul.f32 12.0, %v1406_v42 }
 0x508   : > { %v1409_v53 = vsub.f32 %v3076_v35, %v1407_v45  ;;  %v1411_v18 = vsub.f32 %v3070_v29, %v1407_v45  ;;  %v1413_v54 = vsub.f32 %v3081_v27, %v1407_v45  ;;  %v1416_v21 = vmul.f32 %v1408_v22, %v1408_v22 }
 0x509   : > { %v1418_v37 = vmul.f32 %v1410_v32, %v1410_v32  ;;  %v1415_v5 = vsub.f32 %v3092_v20, %v1407_v45  ;;  %v1420_v61 = vmul.f32 %v1412_v13, %v1412_v13  ;;  %v1422_v51 = vmul.f32 %v1414_v43, %v1414_v43 }
 0x50a   : > { %v1417_v25 = vmul.f32 %v1409_v53, %v1409_v53  ;;  %v1419_v8 = vmul.f32 %v1411_v18, %v1411_v18  ;;  %v1421_v15 = vmul.f32 %v1413_v54, %v1413_v54  ;;  %v1443_v56 = vmul.f32 12.0, %v1407_v45 }
 0x50b   : > { %v1424_v1 = vadd.f32 %v1418_v37, %v1416_v21  ;;  %v1423_v62 = vmul.f32 %v1415_v5, %v1415_v5  ;;  %v1444_v63 = vmul.f32 %v1442_v30, %v1406_v42  ;;  %v1468_v21 = vpop.permute.xlu1 %1467 }
 0x50c   : > { %v1433_v3 = vadd.f32 %v1419_v8, %v1417_v25  ;;  %v1445_v24 = vmul.f32 %v1443_v56, %v1407_v45  ;;  %v1476_v8 = vpop.permute.xlu0 %1475  ;;  %v2353_v56 = vld [vmem:[%s3361_s5] sm:$0xff]  }
 0x50d   : > { %v1425_v58 = vadd.f32 %v1424_v1, %v1420_v61 }
 0x50e   : > { %v1434_v39 = vadd.f32 %v1433_v3, %v1421_v15 }
 0x50f   : > { %v1426_v17 = vadd.f32 %v1425_v58, %v1422_v51  ;;  %v1488_v37 = vpop.permute.xlu1 %1487 }
 0x510   : > { %v1435_v59 = vadd.f32 %v1434_v39, %v1423_v62 }
 0x511   : > { %v1427_v23 = vrot.slane %v1426_v17, 4 }
 0x512   : > { %v1436_v7 = vrot.slane %v1435_v59, 4 }
 0x513   : > { %v1428_v28 = vadd.f32 %v1427_v23, %v1426_v17  ;;  %v1492_v30 = vpop.permute.xlu1 %1491 }
 0x514   : > { %v1437_v36 = vadd.f32 %v1436_v7, %v1435_v59 }
 0x515   : > { %v1429_v57 = vrot.slane %v1428_v28, 2 }
 0x516   : > { %v1438_v47 = vrot.slane %v1437_v36, 2 }
 0x517   : > { %v1430_v38 = vadd.f32 %v1429_v57, %v1428_v28 }
 0x518   : > { %v1439_v33 = vadd.f32 %v1438_v47, %v1437_v36 }
 0x519   : > { %v1431_v34 = vrot.slane %v1430_v38, 1 }
 0x51a   : > { %v1440_v4 = vrot.slane %v1439_v33, 1 }
 0x51b   : > { %v1432_v40 = vadd.f32 %v1431_v34, %v1430_v38  ;;  %v2355_v34 = vld [vmem:[%s3361_s5 + $0x10] sm:$0xff]  }
 0x51c   : > { %v1441_v50 = vadd.f32 %v1440_v4, %v1439_v33  ;;  %v2356_v4 = vld [vmem:[%s3361_s5 + $0x18] sm:$0xff]  }
 0x51d   : > { %v1446_v31 = vsub.f32 %v1432_v40, %v1444_v63  ;;  %v2499_v40 = vmov 7   ;;  %v2500_v63 = vmov 5  }
 0x51e   : > { %v1447_v2 = vsub.f32 %v1441_v50, %v1445_v24  ;;  %2335 = vset.pattern.permute.xlu1 %v2499_v40  ;;  %2336 = vset.pattern.permute.xlu0 %v2499_v40  ;;  %v2501_v50 = vmov 6   ;;  %v2502_v24 = vmov 8  }
 0x51f   : > { %v1448_v60 = vmul.f32 0.05, %v1446_v31  ;;  %1890 = vperm.xlu1 %2335, %v3017_v11   ;;  %1894 = vperm.xlu0 %2336, %v3023_v14   ;;  %v3134_v31 = vpop.permute.xlu1 %1546 }
 0x520   : > { %v1449_v55 = vmul.f32 0.05, %v1447_v2  ;;  %v1537_v2 = vpop.permute.xlu0 %1536 }
 0x521   : > { %v1450_v41 = vadd.f32 1e-05, %v1448_v60 }
 0x522   : > { %v1451_v26 = vadd.f32 1e-05, %v1449_v55 }
 0x523   : > { %2379 = vrsqrt.f32 %v1450_v41  ;;  %1898 = vperm.xlu1 %2335, %v3002_v19   ;;  %2337 = vset.pattern.permute.xlu0 %v2500_v63  ;;  %v3137_v60 = vpop.permute.xlu1 %1551 }
 0x524   : > { %2381 = vrsqrt.f32 %v1451_v26  ;;  %1988 = vperm.xlu0 %2337, %v3017_v11   ;;  %v1532_v41 = vpop.permute.xlu0 %1531 }
 0x527   : > { %1902 = vperm.xlu1 %2335, %v3008_v9  }
 0x528   : > { %2339 = vset.pattern.permute.xlu0 %v2501_v50 }
 0x529   : > { %2012 = vperm.xlu0 %2339, %v3017_v11  }
 0x52b   : > { %2338 = vset.pattern.permute.xlu1 %v2500_v63 }
 0x52c   : > { %1992 = vperm.xlu1 %2338, %v3023_v14  }
 0x52d   : > { %2020 = vperm.xlu0 %2339, %v3002_v19  }
 0x530   : > { %v2380_v25 = vpop.eup %2379  ;;  %1996 = vperm.xlu1 %2338, %v3002_v19  }
 0x531   : > { %v2382_v61 = vpop.eup %2381  ;;  %v1458_v1 = vmul.f32 %v2380_v25, %v1412_v13  ;;  %v1454_v15 = vmul.f32 %v2380_v25, %v1408_v22  ;;  %v1456_v42 = vmul.f32 %v2380_v25, %v1410_v32  ;;  %v1460_v3 = vmul.f32 %v2380_v25, %v1414_v43  ;;  %2343 = vset.pattern.permute.xlu0 %v2502_v24 }
 0x532   : > { %v1459_v45 = vmul.f32 %v2382_v61, %v1413_v54  ;;  %v1455_v51 = vmul.f32 %v2382_v61, %v1409_v53  ;;  %v1457_v58 = vmul.f32 %v2382_v61, %v1411_v18  ;;  %v1461_v62 = vmul.f32 %v2382_v61, %v1415_v5  ;;  %2040 = vperm.xlu0 %2343, %v3023_v14  }
 0x533   : > { %v1482_v39 = vmul.f32 %v1472_v12, %v1458_v1  ;;  %v1484_v17 = vmul.f32 %v1476_v8, %v1460_v3  ;;  %v1478_v57 = vmul.f32 %v1464_v44, %v1454_v15  ;;  %v1480_v47 = vmul.f32 %v1468_v21, %v1456_v42 }
 0x534   : > { %v1483_v59 = vmul.f32 %v1472_v12, %v1459_v45  ;;  %v1479_v23 = vmul.f32 %v1464_v44, %v1455_v51  ;;  %v1481_v7 = vmul.f32 %v1468_v21, %v1457_v58  ;;  %v1485_v28 = vmul.f32 %v1476_v8, %v1461_v62  ;;  %2340 = vset.pattern.permute.xlu1 %v2501_v50  ;;  %v1522_v21 = vpop.permute.xlu0 %1521 }
 0x535   : > { %v1506_v36 = vadd.f32 %v1496_v46, %v1482_v39  ;;  %v1508_v38 = vadd.f32 %v1500_v16, %v1484_v17  ;;  %v1502_v54 = vadd.f32 %v1488_v37, %v1478_v57  ;;  %v1504_v18 = vadd.f32 %v1492_v30, %v1480_v47  ;;  %2016 = vperm.xlu1 %2340, %v3023_v14   ;;  %v1542_v14 = vpop.permute.xlu1 %1541 }
 0x536   : > { %v1507_v33 = vadd.f32 %v1496_v46, %v1483_v59  ;;  %v1503_v13 = vadd.f32 %v1488_v37, %v1479_v23  ;;  %v1509_v22 = vadd.f32 %v1500_v16, %v1485_v28  ;;  %v1505_v32 = vadd.f32 %v1492_v30, %v1481_v7  ;;  %v2354_v46 = vld [vmem:[%s3361_s5 + $0x8] sm:$0xff]   ;;  %2048 = vperm.xlu0 %2343, %v3008_v9  }
 0x537   : > { %v1512_v53 = vpack.c.bf16 %v1508_v38, %v1506_v36  ;;  %v1510_v12 = vpack.c.bf16 %v1504_v18, %v1502_v54  ;;  %v2503_v16 = vmov 9  }
 0x538   : > { %v1513_v43 = vpack.c.bf16 %v1509_v22, %v1507_v33  ;;  %v1511_v5 = vpack.c.bf16 %v1505_v32, %v1503_v13 }
 0x539   : > { %2341 = vset.pattern.permute.xlu1 %v2500_v63  ;;  %v1527_v25 = vpop.permute.xlu1 %1526 }
 0x53a   : > { %1598 = vmatprep.subr.bf16.mxu0 %v1513_v43  ;;  %2000 = vperm.xlu1 %2341, %v3008_v9  }
 0x53b   : > { %1599 = vmatpush1.bf16.msra.mxu0 %v1512_v53  ;;  %2347 = vset.pattern.permute.xlu0 %v2503_v16 }
 0x53c   : > { %1600 = vmatprep.subr.bf16.mxu0 %v1511_v5 }
 0x53d   : > { %v1517_v45 = vpop.permute.xlu1 %1516 }
 0x53e   : > { %2342 = vset.pattern.permute.xlu1 %v2502_v24 }
 0x53f   : > { %1601 = vmatpush1.bf16.msra.mxu0 %v1510_v12  ;;  %2036 = vperm.xlu1 %2342, %v3017_v11  }
 0x542   : > { %2256 = vmatmul.mubr.msk.bf16.vlgmr.msra.gmra.mxu0 %vm561_vm0, %v2353_v56 }
 0x543   : > { %1628 = vmatprep.mubr.bf16.mxu0 %v2491_v0  ;;  %2344 = vset.pattern.permute.xlu1 %v2501_v50 }
 0x544   : > { %2024 = vperm.xlu1 %2344, %v3008_v9  }
 0x548   : > { %2345 = vset.pattern.permute.xlu1 %v2502_v24 }
 0x549   : > { %2044 = vperm.xlu1 %2345, %v3002_v19  }
 0x54a   : > { %2257 = vmatmul.mubr.msk.bf16.gmra.mxu0 %vm561_vm0, %v2354_v46 }
 0x54b   : > { %1638 = vmatprep.mubr.bf16.mxu0 %v2491_v0 }
 0x54d   : > { %2346 = vset.pattern.permute.xlu1 %v2503_v16 }
 0x54e   : > { %2078 = vperm.xlu1 %2346, %v3017_v11  }
 0x552   : > { %2258 = vmatmul.mubr.msk.bf16.gmra.mxu0 %vm561_vm0, %v2355_v34 }
 0x553   : > { %1648 = vmatprep.mubr.bf16.mxu0 %v2491_v0 }
 0x55a   : > { %2259 = vmatmul.mubr.msk.bf16.gmra.mxu0 %vm561_vm0, %v2356_v4 }
 0x602   : > { %v1620_v55 = vpop.f32.mrf.mxu0 }
 0x603   : > { %v3158_v17 = vadd.f32 %v1620_v55, %v1517_v45 }
 0x604   : > { %v1622_v26 = vpop.f32.mrf.mxu0 }
 0x605   : > { %v3150_v19 = vadd.f32 %v1622_v26, %v1517_v45  ;;  %v1659_v22 = vmul.f32 %v3158_v17, %v3158_v17 }
 0x606   : > { %v1624_v44 = vpop.f32.mrf.mxu0 }
 0x607   : > { %v3152_v51 = vadd.f32 %v1624_v44, %v1522_v21  ;;  %v1660_v36 = vmul.f32 %v3150_v19, %v3150_v19  ;;  %v1675_v24 = vmul.f32 %v1659_v22, %v3158_v17 }
 0x608   : > { %v1626_v37 = vpop.f32.mrf.mxu0 }
 0x609   : > { %v3142_v8 = vadd.f32 %v1626_v37, %v1522_v21  ;;  %v1661_v57 = vmul.f32 %v3152_v51, %v3152_v51  ;;  %v1676_v12 = vmul.f32 %v1660_v36, %v3150_v19 }
 0x60a   : > { %v1630_v61 = vpop.f32.mrf.mxu0 }
 0x60b   : > { %v1662_v1 = vmul.f32 %v3142_v8, %v3142_v8  ;;  %v3171_v30 = vadd.f32 %v1630_v61, %v1527_v25  ;;  %v1677_v56 = vmul.f32 %v1661_v57, %v3152_v51  ;;  %v1692_v37 = vmul.f32 0.044715, %v1676_v12 }
 0x60c   : > { %v1632_v15 = vpop.f32.mrf.mxu0 }
 0x60d   : > { %v1678_v9 = vmul.f32 %v1662_v1, %v3142_v8  ;;  %v3148_v42 = vadd.f32 %v1632_v15, %v1527_v25  ;;  %v1663_v4 = vmul.f32 %v3171_v30, %v3171_v30 }
 0x60e   : > { %v1634_v3 = vpop.f32.mrf.mxu0 }
 0x60f   : > { %v1664_v58 = vmul.f32 %v3148_v42, %v3148_v42  ;;  %v1694_v59 = vmul.f32 0.044715, %v1678_v9  ;;  %v3161_v7 = vadd.f32 %v1634_v3, %v1532_v41  ;;  %v1679_v9 = vmul.f32 %v1663_v4, %v3171_v30 }
 0x610   : > { %v1636_v62 = vpop.f32.mrf.mxu0 }
 0x611   : > { %v3156_v39 = vadd.f32 %v1636_v62, %v1532_v41  ;;  %v1680_v23 = vmul.f32 %v1664_v58, %v3148_v42  ;;  %v1710_v32 = vadd.f32 %v1694_v59, %v3142_v8  ;;  %v1665_v53 = vmul.f32 %v3161_v7, %v3161_v7 }
 0x612   : > { %v1640_v11 = vpop.f32.mrf.mxu0  ;;  %v1695_v4 = vmul.f32 0.044715, %v1679_v9 }
 0x613   : > { %v1666_v28 = vmul.f32 %v3156_v39, %v3156_v39  ;;  %v3169_v47 = vadd.f32 %v1640_v11, %v1537_v2  ;;  %v1696_v54 = vmul.f32 0.044715, %v1680_v23  ;;  %v1726_v16 = vmul.f32 0.7978846, %v1710_v32 }
 0x614   : > { %v1642_v38 = vpop.f32.mrf.mxu0  ;;  %v1681_v26 = vmul.f32 %v1665_v53, %v3161_v7 }
 0x615   : > { %v1682_v33 = vmul.f32 %v1666_v28, %v3156_v39  ;;  %v3174_v13 = vadd.f32 %v1642_v38, %v1537_v2  ;;  %v1667_v46 = vmul.f32 %v3169_v47, %v3169_v47  ;;  %v1712_v41 = vadd.f32 %v1696_v54, %v3148_v42 }
 0x616   : > { %v1644_v43 = vpop.f32.mrf.mxu0  ;;  %2383 = vtanh.f32 %v1726_v16  ;;  %v1697_v36 = vmul.f32 0.044715, %v1681_v26 }
 0x617   : > { %v1668_v18 = vmul.f32 %v3174_v13, %v3174_v13  ;;  %v3183_v5 = vadd.f32 %v1644_v43, %v1542_v14  ;;  %v1698_v40 = vmul.f32 0.044715, %v1682_v33  ;;  %v1683_v25 = vmul.f32 %v1667_v46, %v3169_v47 }
 0x618   : > { %v1646_v34 = vpop.f32.mrf.mxu0  ;;  %v1728_v28 = vmul.f32 0.7978846, %v1712_v41 }
 0x619   : > { %v1684_v63 = vmul.f32 %v1668_v18, %v3174_v13  ;;  %v1669_v50 = vmul.f32 %v3183_v5, %v3183_v5  ;;  %v3195_v2 = vadd.f32 %v1646_v34, %v1542_v14  ;;  %v1693_v14 = vmul.f32 0.044715, %v1677_v56 }
 0x61a   : > { %v1650_v55 = vpop.f32.mrf.mxu0  ;;  %v1714_v3 = vadd.f32 %v1698_v40, %v3156_v39  ;;  %v1699_v38 = vmul.f32 0.044715, %v1683_v25  ;;  %2385 = vtanh.f32 %v1728_v28 }
 0x61b   : > { %v1700_v44 = vmul.f32 0.044715, %v1684_v63  ;;  %v1685_v21 = vmul.f32 %v1669_v50, %v3183_v5  ;;  %v1670_v61 = vmul.f32 %v3195_v2, %v3195_v2  ;;  %v3204_v1 = vadd.f32 %v1650_v55, %v3134_v31 }
 0x61c   : > { %v1652_v15 = vpop.f32.mrf.mxu0  ;;  %v1730_v54 = vmul.f32 0.7978846, %v1714_v3  ;;  %v1715_v50 = vadd.f32 %v1699_v38, %v3169_v47 }
 0x61d   : > { %v1716_v45 = vadd.f32 %v1700_v44, %v3174_v13  ;;  %v1701_v58 = vmul.f32 0.044715, %v1685_v21  ;;  %v1686_v62 = vmul.f32 %v1670_v61, %v3195_v2  ;;  %v1671_v59 = vmul.f32 %v3204_v1, %v3204_v1 }
 0x61e   : > { %v3213_v11 = vadd.f32 %v1652_v15, %v3134_v31  ;;  %v1654_v23 = vpop.f32.mrf.mxu0  ;;  %2387 = vtanh.f32 %v1730_v54  ;;  %v1713_v21 = vadd.f32 %v1697_v36, %v3161_v7  ;;  %v1691_v15 = vmul.f32 0.044715, %v1675_v24 }
 0x61f   : > { %v3216_v57 = vadd.f32 %v1654_v23, %v3137_v60  ;;  %v1702_v33 = vmul.f32 0.044715, %v1686_v62  ;;  %v1687_v22 = vmul.f32 %v1671_v59, %v3204_v1  ;;  %v1717_v53 = vadd.f32 %v1701_v58, %v3183_v5 }
 0x620   : > { %v1672_v32 = vmul.f32 %v3213_v11, %v3213_v11  ;;  %v1656_v43 = vpop.f32.mrf.mxu0  ;;  %v1732_v12 = vmul.f32 0.7978846, %v1716_v45  ;;  %v1711_v45 = vadd.f32 %v1695_v4, %v3171_v30  ;;  %v1731_v58 = vmul.f32 0.7978846, %v1715_v50 }
 0x621   : > { %v1673_v31 = vmul.f32 %v3216_v57, %v3216_v57  ;;  %v3225_v18 = vadd.f32 %v1656_v43, %v3137_v60  ;;  %v1718_v56 = vadd.f32 %v1702_v33, %v3195_v2  ;;  %v1703_v46 = vmul.f32 0.044715, %v1687_v22 }
 0x622   : > { %v1688_v34 = vmul.f32 %v1672_v32, %v3213_v11  ;;  %v1733_v41 = vmul.f32 0.7978846, %v1717_v53  ;;  %2389 = vtanh.f32 %v1732_v12  ;;  %v1708_v59 = vadd.f32 %v1692_v37, %v3150_v19 }
 0x623   : > { %v1689_v40 = vmul.f32 %v1673_v31, %v3216_v57  ;;  %v1674_v63 = vmul.f32 %v3225_v18, %v3225_v18  ;;  %v1734_v16 = vmul.f32 0.7978846, %v1718_v56  ;;  %v1719_v55 = vadd.f32 %v1703_v46, %v3204_v1  ;;  %v2384_v33 = vpop.eup %2383 }
 0x624   : > { %v1704_v60 = vmul.f32 0.044715, %v1688_v34  ;;  %v1709_v36 = vadd.f32 %v1693_v14, %v3152_v51  ;;  %v1729_v38 = vmul.f32 0.7978846, %v1713_v21  ;;  %v1707_v22 = vadd.f32 %v1691_v15, %v3158_v17 }
 0x625   : > { %v1705_v26 = vmul.f32 0.044715, %v1689_v40  ;;  %v1690_v44 = vmul.f32 %v1674_v63, %v3225_v18  ;;  %v1735_v25 = vmul.f32 0.7978846, %v1719_v55  ;;  %2391 = vtanh.f32 %v1734_v16 }
 0x626   : > { %v1720_v61 = vadd.f32 %v1704_v60, %v3213_v11  ;;  %v1727_v32 = vmul.f32 0.7978846, %v1711_v45  ;;  %v1724_v43 = vmul.f32 0.7978846, %v1708_v59  ;;  %v1725_v54 = vmul.f32 0.7978846, %v1709_v36 }
 0x627   : > { %v1721_v9 = vadd.f32 %v1705_v26, %v3216_v57  ;;  %v1706_v3 = vmul.f32 0.044715, %v1690_v44  ;;  %2393 = vtanh.f32 %v1735_v25  ;;  %v2386_v37 = vpop.eup %2385  ;;  %v1723_v53 = vmul.f32 0.7978846, %v1707_v22 }
 0x628   : > { %v1736_v62 = vmul.f32 0.7978846, %v1720_v61  ;;  %2395 = vtanh.f32 %v1733_v41  ;;  %v1758_v22 = vadd.f32 1.0, %v2384_v33 }
 0x629   : > { %v1737_v23 = vmul.f32 0.7978846, %v1721_v9  ;;  %v1722_v28 = vadd.f32 %v1706_v3, %v3225_v18 }
 0x62a   : > { %2397 = vtanh.f32 %v1736_v62 }
 0x62b   : > { %2399 = vtanh.f32 %v1737_v23  ;;  %v1738_v24 = vmul.f32 0.7978846, %v1722_v28  ;;  %v2388_v31 = vpop.eup %2387  ;;  %v1760_v23 = vadd.f32 1.0, %v2386_v37 }
 0x62c   : > { %2401 = vtanh.f32 %v1731_v58  ;;  %v1762_v44 = vadd.f32 1.0, %v2388_v31 }
 0x62d   : > { %2403 = vtanh.f32 %v1738_v24 }
 0x62e   : > { %2405 = vtanh.f32 %v1729_v38  ;;  %v1778_v31 = vmul.f32 0.5, %v1762_v44 }
 0x62f   : > { %2407 = vtanh.f32 %v1727_v32  ;;  %v2390_v14 = vpop.eup %2389 }
 0x630   : > { %2409 = vtanh.f32 %v1724_v43  ;;  %v1764_v60 = vadd.f32 1.0, %v2390_v14 }
 0x631   : > { %2411 = vtanh.f32 %v1725_v54 }
 0x632   : > { %v2392_v12 = vpop.eup %2391  ;;  %2413 = vtanh.f32 %v1723_v53  ;;  %v1780_v59 = vmul.f32 0.5, %v1764_v60 }
 0x633   : > { %v1766_v4 = vadd.f32 1.0, %v2392_v12 }
 0x634   : > { %v2394_v56 = vpop.eup %2393 }
 0x635   : > { %v2396_v46 = vpop.eup %2395  ;;  %v1767_v63 = vadd.f32 1.0, %v2394_v56  ;;  %v1782_v9 = vmul.f32 0.5, %v1766_v4  ;;  %v1776_v4 = vmul.f32 0.5, %v1760_v23 }
 0x636   : > { %v1765_v26 = vadd.f32 1.0, %v2396_v46 }
 0x637   : > { %v2398_v34 = vpop.eup %2397  ;;  %v1783_v45 = vmul.f32 0.5, %v1767_v63  ;;  %v1798_v53 = vmul.f32 %v1782_v9, %v3195_v2  ;;  %v1794_v2 = vmul.f32 %v1778_v31, %v3156_v39 }
 0x638   : > { %v2400_v40 = vpop.eup %2399  ;;  %v1768_v50 = vadd.f32 1.0, %v2398_v34  ;;  %v1781_v38 = vmul.f32 0.5, %v1765_v26  ;;  %v1796_v34 = vmul.f32 %v1780_v59, %v3174_v13  ;;  %v1792_v13 = vmul.f32 %v1776_v4, %v3148_v42 }
 0x639   : > { %v2402_v16 = vpop.eup %2401  ;;  %v1769_v55 = vadd.f32 1.0, %v2400_v40  ;;  %v1799_v56 = vmul.f32 %v1783_v45, %v3204_v1 }
 0x63a   : > { %v2404_v41 = vpop.eup %2403  ;;  %v1784_v15 = vmul.f32 0.5, %v1768_v50  ;;  %v1763_v3 = vadd.f32 1.0, %v2402_v16  ;;  %v1797_v33 = vmul.f32 %v1781_v38, %v3183_v5  ;;  %v1774_v50 = vmul.f32 0.5, %v1758_v22 }
 0x63b   : > { %v2406_v21 = vpop.eup %2405  ;;  %v1785_v25 = vmul.f32 0.5, %v1769_v55  ;;  %v1770_v61 = vadd.f32 1.0, %v2404_v41  ;;  %v1806_v44 = vpack.c.bf16 %v1794_v2, %v1792_v13 }
 0x63c   : > { %v2408_v58 = vpop.eup %2407  ;;  %v1761_v36 = vadd.f32 1.0, %v2406_v21  ;;  %v1800_v43 = vmul.f32 %v1784_v15, %v3213_v11  ;;  %v1779_v12 = vmul.f32 0.5, %v1763_v3  ;;  %v1790_v21 = vmul.f32 %v1774_v50, %v3142_v8  ;;  %v2357_v8 = vld [vmem:[%s3362_s6] sm:$0xff]  }
 0x63d   : > { %v1786_v62 = vmul.f32 0.5, %v1770_v61  ;;  %v2410_v28 = vpop.eup %2409  ;;  %v1801_v24 = vmul.f32 %v1785_v25, %v3216_v57  ;;  %v1759_v14 = vadd.f32 1.0, %v2408_v58 }
 0x63e   : > { %v2412_v32 = vpop.eup %2411  ;;  %v1756_v40 = vadd.f32 1.0, %v2410_v28  ;;  %v1777_v57 = vmul.f32 0.5, %v1761_v36  ;;  %v1795_v1 = vmul.f32 %v1779_v12, %v3169_v47 }
 0x63f   : > { %v1802_v54 = vmul.f32 %v1786_v62, %v3225_v18  ;;  %v2414_v46 = vpop.eup %2413  ;;  %v1809_v63 = vpack.c.bf16 %v1801_v24, %v1799_v56  ;;  %v1757_v11 = vadd.f32 1.0, %v2412_v32  ;;  %v1808_v18 = vpack.c.bf16 %v1798_v53, %v1796_v34  ;;  %v1895_v62 = vpop.permute.xlu0 %1894 }
 0x640   : > { %v1755_v16 = vadd.f32 1.0, %v2414_v46  ;;  %v1775_v55 = vmul.f32 0.5, %v1759_v14  ;;  %v1772_v60 = vmul.f32 0.5, %v1756_v40  ;;  %v1793_v41 = vmul.f32 %v1777_v57, %v3161_v7 }
 0x641   : > { %v1810_v37 = vpack.c.bf16 %v1802_v54, %v1800_v43  ;;  %v1807_v26 = vpack.c.bf16 %v1797_v33, %v1795_v1  ;;  %v1773_v5 = vmul.f32 0.5, %v1757_v11 }
 0x642   : > { %v1771_v25 = vmul.f32 0.5, %v1755_v16  ;;  %v1791_v39 = vmul.f32 %v1775_v55, %v3171_v30  ;;  %v1788_v61 = vmul.f32 %v1772_v60, %v3150_v19  ;;  %v2358_v19 = vld [vmem:[%s3362_s6 + $0x8] sm:$0xff]   ;;  %v1891_v30 = vpop.permute.xlu1 %1890 }
 0x643   : > { %1836 = vmatprep.subr.bf16.mxu1 %v1810_v37  ;;  %v1789_v15 = vmul.f32 %v1773_v5, %v3152_v51 }
 0x644   : > { %1837 = vmatpush1.bf16.msra.mxu1 %v1809_v63  ;;  %v1805_v47 = vpack.c.bf16 %v1793_v41, %v1791_v39  ;;  %v1804_v9 = vpack.c.bf16 %v1790_v21, %v1788_v61  ;;  %v1787_v42 = vmul.f32 %v1771_v25, %v3158_v17 }
 0x645   : > { %1838 = vmatprep.subr.bf16.mxu1 %v1808_v18 }
 0x646   : > { %v1803_v7 = vpack.c.bf16 %v1789_v15, %v1787_v42  ;;  %v1899_v36 = vpop.permute.xlu1 %1898 }
 0x648   : > { %1839 = vmatpush1.bf16.msra.mxu1 %v1807_v26 }
 0x649   : > { %1840 = vmatprep.subr.bf16.mxu1 %v1806_v44 }
 0x64c   : > { %1841 = vmatpush1.bf16.msra.mxu1 %v1805_v47 }
 0x64d   : > { %1842 = vmatprep.subr.bf16.mxu1 %v1804_v9 }
 0x650   : > { %1843 = vmatpush1.bf16.msra.mxu1 %v1803_v7 }
 0x653   : > { %2262 = vmatmul.mubr.msk.bf16.vlgmr.msra.gmra.mxu1 %vm1821_vm6, %v2357_v8 }
 0x654   : > { %1870 = vmatprep.mubr.bf16.mxu1 %v2491_v0 }
 0x65b   : > { %2263 = vmatmul.mubr.msk.bf16.gmra.mxu1 %vm1821_vm6, %v2358_v19 }
 0x713   : > { %v1862_v51 = vpop.f32.mrf.mxu1 }
 0x714   : > { %v1881_v59 = vadd.f32 %v1862_v51, %v3067_v49 }
 0x715   : > { %v1864_v17 = vpop.f32.mrf.mxu1 }
 0x716   : > { %v1882_v0 = vadd.f32 %v1864_v17, %v3076_v35  ;;  %v1905_v32 = vadd.f32 %v1891_v30, %v1881_v59 }
 0x717   : > { %v1866_v3 = vpop.f32.mrf.mxu1 }
 0x718   : > { %v1883_v45 = vadd.f32 %v1866_v3, %v3064_v10  ;;  %v1906_v31 = vadd.f32 %v1891_v30, %v1882_v0 }
 0x719   : > { %v1868_v58 = vpop.f32.mrf.mxu1 }
 0x71a   : > { %v1884_v23 = vadd.f32 %v1868_v58, %v3070_v29  ;;  %v1907_v38 = vadd.f32 %v1895_v62, %v1883_v45  ;;  %v1903_v29 = vpop.permute.xlu1 %1902 }
 0x71b   : > { %v1872_v28 = vpop.f32.mrf.mxu1 }
 0x71c   : > { %v1885_v24 = vadd.f32 %v1872_v28, %v3073_v52  ;;  %v1908_v43 = vadd.f32 %v1895_v62, %v1884_v23  ;;  %v1913_v14 = vadd.f32 %v1907_v38, %v1905_v32 }
 0x71d   : > { %v1874_v22 = vpop.f32.mrf.mxu1 }
 0x71e   : > { %v1909_v54 = vadd.f32 %v1899_v36, %v1885_v24  ;;  %v1886_v53 = vadd.f32 %v1874_v22, %v3081_v27  ;;  %v1922_v46 = vadd.f32 %v1908_v43, %v1906_v31 }
 0x71f   : > { %v1876_v10 = vpop.f32.mrf.mxu1 }
 0x720   : > { %v1910_v12 = vadd.f32 %v1899_v36, %v1886_v53  ;;  %v1887_v49 = vadd.f32 %v1876_v10, %v3087_v48  ;;  %v1914_v37 = vadd.f32 %v1913_v14, %v1909_v54  ;;  %v1993_v36 = vpop.permute.xlu1 %1992 }
 0x721   : > { %v1878_v56 = vpop.f32.mrf.mxu1 }
 0x722   : > { %v1911_v35 = vadd.f32 %v1903_v29, %v1887_v49  ;;  %v1888_v34 = vadd.f32 %v1878_v56, %v3092_v20  ;;  %v1923_v52 = vadd.f32 %v1922_v46, %v1910_v12 }
 0x724   : > { %v1915_v4 = vadd.f32 %v1914_v37, %v1911_v35  ;;  %v1912_v40 = vadd.f32 %v1903_v29, %v1888_v34 }
 0x726   : > { %v1916_v57 = vrot.slane %v1915_v4, 4  ;;  %v1924_v33 = vadd.f32 %v1923_v52, %v1912_v40 }
 0x728   : > { %v1917_v63 = vadd.f32 %v1916_v57, %v1915_v4  ;;  %v1925_v27 = vrot.slane %v1924_v33, 4  ;;  %v1989_v4 = vpop.permute.xlu0 %1988 }
 0x72a   : > { %v1918_v11 = vrot.slane %v1917_v63, 2  ;;  %v1926_v18 = vadd.f32 %v1925_v27, %v1924_v33 }
 0x72c   : > { %v1919_v2 = vadd.f32 %v1918_v11, %v1917_v63  ;;  %v1927_v50 = vrot.slane %v1926_v18, 2  ;;  %v2013_v33 = vpop.permute.xlu0 %2012 }
 0x72e   : > { %v1920_v16 = vrot.slane %v1919_v2, 1  ;;  %v1928_v48 = vadd.f32 %v1927_v50, %v1926_v18 }
 0x730   : > { %v1921_v55 = vadd.f32 %v1920_v16, %v1919_v2  ;;  %v1929_v1 = vrot.slane %v1928_v48, 1  ;;  %v2021_v27 = vpop.permute.xlu0 %2020 }
 0x732   : > { %v1931_v13 = vmul.f32 0.05, %v1921_v55  ;;  %v1930_v60 = vadd.f32 %v1929_v1, %v1928_v48 }
 0x734   : > { %v1932_v41 = vmul.f32 0.05, %v1930_v60  ;;  %v1933_v26 = vsub.f32 %v1905_v32, %v1931_v13  ;;  %v1937_v20 = vsub.f32 %v1909_v54, %v1931_v13  ;;  %v1935_v5 = vsub.f32 %v1907_v38, %v1931_v13 }
 0x735   : > { %v1939_v44 = vsub.f32 %v1911_v35, %v1931_v13  ;;  %v1967_v32 = vmul.f32 12.0, %v1931_v13 }
 0x736   : > { %v1934_v21 = vsub.f32 %v1906_v31, %v1932_v41  ;;  %v1938_v25 = vsub.f32 %v1910_v12, %v1932_v41  ;;  %v1936_v39 = vsub.f32 %v1908_v43, %v1932_v41  ;;  %v1941_v61 = vmul.f32 %v1933_v26, %v1933_v26  ;;  %v1997_v12 = vpop.permute.xlu1 %1996 }
 0x737   : > { %v1943_v47 = vmul.f32 %v1935_v5, %v1935_v5  ;;  %v1940_v9 = vsub.f32 %v1912_v40, %v1932_v41  ;;  %v1945_v7 = vmul.f32 %v1937_v20, %v1937_v20  ;;  %v1947_v19 = vmul.f32 %v1939_v44, %v1939_v44 }
 0x738   : > { %v1942_v15 = vmul.f32 %v1934_v21, %v1934_v21  ;;  %v1944_v42 = vmul.f32 %v1936_v39, %v1936_v39  ;;  %v1946_v51 = vmul.f32 %v1938_v25, %v1938_v25  ;;  %v1968_v53 = vmul.f32 12.0, %v1932_v41 }
 0x739   : > { %v1949_v8 = vadd.f32 %v1943_v47, %v1941_v61  ;;  %v1948_v3 = vmul.f32 %v1940_v9, %v1940_v9  ;;  %v1969_v14 = vmul.f32 %v1967_v32, %v1931_v13  ;;  %v2041_v61 = vpop.permute.xlu0 %2040 }
 0x73a   : > { %v1958_v17 = vadd.f32 %v1944_v42, %v1942_v15  ;;  %v1970_v29 = vmul.f32 %v1968_v53, %v1932_v41  ;;  %v2017_v35 = vpop.permute.xlu1 %2016 }
 0x73b   : > { %v1950_v30 = vadd.f32 %v1949_v8, %v1945_v7 }
 0x73c   : > { %v1959_v58 = vadd.f32 %v1958_v17, %v1946_v51 }
 0x73d   : > { %v1951_v45 = vadd.f32 %v1950_v30, %v1947_v19 }
 0x73e   : > { %v1960_v59 = vadd.f32 %v1959_v58, %v1948_v3  ;;  %v2001_v57 = vpop.permute.xlu1 %2000  ;;  %v2049_v58 = vpop.permute.xlu0 %2048 }
 0x73f   : > { %v1952_v62 = vrot.slane %v1951_v45, 4 }
 0x740   : > { %v1961_v28 = vrot.slane %v1960_v59, 4 }
 0x741   : > { %v1953_v23 = vadd.f32 %v1952_v62, %v1951_v45 }
 0x742   : > { %v1962_v38 = vadd.f32 %v1961_v28, %v1960_v59  ;;  %v2037_v63 = vpop.permute.xlu1 %2036 }
 0x743   : > { %v1954_v0 = vrot.slane %v1953_v23, 2 }
 0x744   : > { %v1963_v22 = vrot.slane %v1962_v38, 2 }
 0x745   : > { %v1955_v24 = vadd.f32 %v1954_v0, %v1953_v23 }
 0x746   : > { %v1964_v54 = vadd.f32 %v1963_v22, %v1962_v38  ;;  %v2025_v48 = vpop.permute.xlu1 %2024 }
 0x747   : > { %v1956_v43 = vrot.slane %v1955_v24, 1 }
 0x748   : > { %v1965_v31 = vrot.slane %v1964_v54, 1 }
 0x749   : > { %v1957_v10 = vadd.f32 %v1956_v43, %v1955_v24 }
 0x74a   : > { %v1966_v49 = vadd.f32 %v1965_v31, %v1964_v54 }
 0x74b   : > { %v1971_v56 = vsub.f32 %v1957_v10, %v1969_v14 }
 0x74c   : > { %v1972_v46 = vsub.f32 %v1966_v49, %v1970_v29 }
 0x74d   : > { %v1973_v37 = vmul.f32 0.05, %v1971_v56 }
 0x74e   : > { %v1974_v34 = vmul.f32 0.05, %v1972_v46 }
 0x74f   : > { %v1975_v52 = vadd.f32 1e-05, %v1973_v37 }
 0x750   : > { %v1976_v40 = vadd.f32 1e-05, %v1974_v34 }
 0x751   : > { %2415 = vrsqrt.f32 %v1975_v52 }
 0x752   : > { %2417 = vrsqrt.f32 %v1976_v40 }
 0x75e   : > { %v2416_v11 = vpop.eup %2415 }
 0x75f   : > { %v1981_v18 = vmul.f32 %v2416_v11, %v1935_v5  ;;  %v1983_v2 = vmul.f32 %v2416_v11, %v1937_v20  ;;  %v1979_v50 = vmul.f32 %v2416_v11, %v1933_v26  ;;  %v1985_v16 = vmul.f32 %v2416_v11, %v1939_v44  ;;  %v2418_v55 = vpop.eup %2417 }
 0x760   : > { %v1982_v1 = vmul.f32 %v2418_v55, %v1936_v39  ;;  %v1984_v60 = vmul.f32 %v2418_v55, %v1938_v25  ;;  %v1980_v47 = vmul.f32 %v2418_v55, %v1934_v21  ;;  %v1986_v42 = vmul.f32 %v2418_v55, %v1940_v9  ;;  %v2045_v39 = vpop.permute.xlu1 %2044 }
 0x761   : > { %v2005_v13 = vmul.f32 %v1993_v36, %v1981_v18  ;;  %v2007_v41 = vmul.f32 %v1997_v12, %v1983_v2  ;;  %v2003_v15 = vmul.f32 %v1989_v4, %v1979_v50  ;;  %v2009_v7 = vmul.f32 %v2001_v57, %v1985_v16 }
 0x762   : > { %v2006_v8 = vmul.f32 %v1993_v36, %v1982_v1  ;;  %v2008_v19 = vmul.f32 %v1997_v12, %v1984_v60  ;;  %v2004_v30 = vmul.f32 %v1989_v4, %v1980_v47  ;;  %v2010_v5 = vmul.f32 %v2001_v57, %v1986_v42 }
 0x763   : > { %v3274_v51 = vadd.f32 %v2017_v35, %v2005_v13  ;;  %v3276_v20 = vadd.f32 %v2013_v33, %v2003_v15  ;;  %v3278_v26 = vadd.f32 %v2021_v27, %v2007_v41  ;;  %v3286_v3 = vadd.f32 %v2025_v48, %v2009_v7 }
 0x764   : > { %v3280_v44 = vadd.f32 %v2017_v35, %v2006_v8  ;;  %v3283_v17 = vadd.f32 %v2013_v33, %v2004_v30  ;;  %v2032_v9 = vadd.f32 %v2021_v27, %v2008_v19  ;;  %v3290_v59 = vadd.f32 %v2025_v48, %v2010_v5  ;;  %v2079_v37 = vpop.permute.xlu1 %2078 }
 0x765   : > { %v2053_v25 = vmul.f32 %v2041_v61, %v3274_v51  ;;  %v2051_v21 = vmul.f32 %v2037_v63, %v3276_v20  ;;  %v2055_v28 = vmul.f32 %v2045_v39, %v3278_v26  ;;  %v2057_v24 = vmul.f32 %v2049_v58, %v3286_v3 }
 0x766   : > { %v2054_v45 = vmul.f32 %v2041_v61, %v3280_v44  ;;  %v2052_v62 = vmul.f32 %v2037_v63, %v3283_v17  ;;  %v2056_v0 = vmul.f32 %v2045_v39, %v2032_v9  ;;  %v2058_v32 = vmul.f32 %v2049_v58, %v3290_v59 }
 0x767   : > { %v2059_v23 = vadd.f32 %v2053_v25, %v2051_v21  ;;  %v2104_v41 = vshrl.u32 %v428_v6, 7 }
 0x768   : > { %v2068_v36 = vadd.f32 %v2054_v45, %v2052_v62 }
 0x769   : > { %v2060_v38 = vadd.f32 %v2059_v23, %v2055_v28  ;;  %v2105_v61 = vsub.s32 0, %v2104_v41 }
 0x76a   : > { %v2069_v22 = vadd.f32 %v2068_v36, %v2056_v0  ;;  %v401_v36 = vld [vmem:[%s3363_s7 + $0x18] sm:$0xff] }
 0x76b   : > { %v2061_v43 = vadd.f32 %v2060_v38, %v2057_v24 }
 0x76c   : > { %v2070_v53 = vadd.f32 %v2069_v22, %v2058_v32 }
 0x76d   : > { %v2062_v54 = vrot.slane %v2061_v43, 4 }
 0x76e   : > { %v2071_v31 = vrot.slane %v2070_v53, 4 }
 0x76f   : > { %v2063_v10 = vadd.f32 %v2062_v54, %v2061_v43 }
 0x770   : > { %v2072_v14 = vadd.f32 %v2071_v31, %v2070_v53 }
 0x771   : > { %v2064_v12 = vrot.slane %v2063_v10, 2 }
 0x772   : > { %v2073_v29 = vrot.slane %v2072_v14, 2 }
 0x773   : > { %v2065_v49 = vadd.f32 %v2064_v12, %v2063_v10  ;;  %v397_v12 = vld [vmem:[%s3366_s10] sm:$0x1] }
 0x774   : > { %v2074_v46 = vadd.f32 %v2073_v29, %v2072_v14 }
 0x775   : > { %v2066_v56 = vrot.slane %v2065_v49, 1 }
 0x776   : > { %v2075_v34 = vrot.slane %v2074_v46, 1 }
 0x777   : > { %v2067_v35 = vadd.f32 %v2066_v56, %v2065_v49 }
 0x778   : > { %v2076_v52 = vadd.f32 %v2075_v34, %v2074_v46 }
 0x779   : > { %v2081_v4 = vadd.f32 %v2079_v37, %v2067_v35 }
 0x77a   : > { %v2082_v40 = vadd.f32 %v2079_v37, %v2076_v52 }
 0x77b   : > { %v2084_v57 = vsel %vm2083_vm7, %v2081_v4, -inf }
 0x77c   : > { %v2085_v33 = vsel %vm2083_vm7, %v2082_v40, -inf }
 0x77d   : > { %v2086_v63 = vmax.f32 %v2084_v57, %v2085_v33 }
 0x77f   : > { %2087 = vmax.xlane.f32.xlu0 %v2086_v63 }
 0x808   : > { %v2088_v27 = vpop.xlane.xlu0 %2087 }
 0x809   : > { %v2089_v11 = vsub.f32 %v2081_v4, %v2088_v27  ;;  %v2090_v18 = vsub.f32 %v2082_v40, %v2088_v27 }
 0x80b   : > { %v2091_v2 = vmul.f32 1.442695, %v2089_v11  ;;  %v2093_v50 = vmul.f32 1.442695, %v2090_v18 }
 0x80d   : > { %2419 = vpow2.f32 %v2091_v2 }
 0x80e   : > { %2421 = vpow2.f32 %v2093_v50 }
 0x81a   : > { %v2420_v16 = vpop.eup %2419 }
 0x81b   : > { %v2422_v48 = vpop.eup %2421  ;;  %v2095_v55 = vsel %vm2083_vm7, %v2420_v16, 0.0 }
 0x81c   : > { %v2096_v1 = vsel %vm2083_vm7, %v2422_v48, 0.0 }
 0x81d   : > { %v2097_v13 = vadd.f32 %v2096_v1, %v2095_v55 }
 0x81f   : > { %2098 = vadd.xlane.f32.xlu1 %v2097_v13 }
 0x8a8   : > { %v2099_v60 = vpop.xlane.xlu1 %2098 }
 0x8a9   : > { %2423 = vrcp.f32 %v2099_v60 }
 0x8b6   : > { %v2424_v47 = vpop.eup %2423 }
 0x8b7   : > { %v2101_v15 = vmul.f32 %v2424_v47, %v2420_v16  ;;  %v2102_v42 = vmul.f32 %v2424_v47, %v2422_v48 }
 0x8b9   : > { %v2106_v7 = vrot.slane %v2101_v15, %v2105_v61  ;;  %v2110_v8 = vrot.slane %v2102_v42, %v2105_v61 }
 0x8bb   : > { %v2115_v19 = vmul.f32 %v2106_v7, %v3278_v26  ;;  %v2116_v30 = vmul.f32 %v2110_v8, %v2032_v9  ;;  %v2111_v5 = vmul.f32 %v2106_v7, %v3276_v20  ;;  %v2112_v25 = vmul.f32 %v2110_v8, %v3283_v17  ;;  %v398_v20 = vld [vmem:[%s3363_s7] sm:$0xff] }
 0x8bc   : > { %v2113_v45 = vmul.f32 %v2106_v7, %v3274_v51  ;;  %v2114_v58 = vmul.f32 %v2110_v8, %v3280_v44  ;;  %v2117_v62 = vmul.f32 %v2106_v7, %v3286_v3  ;;  %v2118_v23 = vmul.f32 %v2110_v8, %v3290_v59  ;;  %v399_v51 = vld [vmem:[%s3363_s7 + $0x8] sm:$0xff]  ;;  %v400_v44 = vld [vmem:[%s3363_s7 + $0x10] sm:$0xff] }
 0x8bd   : > { %v2125_v39 = vadd.f32 %v2116_v30, %v2115_v19  ;;  %v2119_v21 = vadd.f32 %v2112_v25, %v2111_v5 }
 0x8be   : > { %v2122_v6 = vadd.f32 %v2114_v58, %v2113_v45  ;;  %v2128_v26 = vadd.f32 %v2118_v23, %v2117_v62 }
 0x8bf   : > { %2126 = vadd.xlane.f32.xlu1 %v2125_v39  ;;  %2120 = vadd.xlane.f32.xlu0 %v2119_v21 }
 0x8c3   : > { %2123 = vadd.xlane.f32.xlu0 %v2122_v6 }
 0x8c7   : > { %2129 = vadd.xlane.f32.xlu0 %v2128_v26 }
 0x948   : > { %v2121_v9 = vpop.xlane.xlu0 %2120  ;;  %v2127_v17 = vpop.xlane.xlu1 %2126 }
 0x949   : > { %v2131_v59 = vmul.f32 %v2121_v9, %v398_v20  ;;  %v2133_v0 = vmul.f32 %v2127_v17, %v400_v44 }
 0x94c   : > { %v2124_v3 = vpop.xlane.xlu0 %2123 }
 0x94d   : > { %v2132_v28 = vmul.f32 %v2124_v3, %v399_v51 }
 0x94f   : > { %v2135_v38 = vadd.f32 %v2132_v28, %v2131_v59 }
 0x950   : > { %v2130_v24 = vpop.xlane.xlu0 %2129 }
 0x951   : > { %v2136_v22 = vadd.f32 %v2135_v38, %v2133_v0  ;;  %v2134_v32 = vmul.f32 %v2130_v24, %v401_v36 }
 0x953   : > { %v2137_v43 = vadd.f32 %v2136_v22, %v2134_v32 }
 0x955   : > { %v2138_v54 = vrot.slane %v2137_v43, 4 }
 0x957   : > { %v2139_v53 = vadd.f32 %v2138_v54, %v2137_v43 }
 0x959   : > { %v2140_v10 = vrot.slane %v2139_v53, 2 }
 0x95b   : > { %v2141_v31 = vadd.f32 %v2140_v10, %v2139_v53 }
 0x95d   : > { %v2142_v14 = vrot.slane %v2141_v31, 1 }
 0x95f   : > { %v2143_v49 = vadd.f32 %v2142_v14, %v2141_v31 }
 0x961   : > { %v2144_v29 = vadd.f32 %v2143_v49, %v397_v12 }
 0x963   : > { %2145 = vst [vmem:[%s378_s14] sm:$0x1] %v2144_v29 }
 0x964   : > { %2442 = shalt.err (!%p2439_p3)
}
 0x965   : > { %s2443_s13 = scalar_lea.hbm %s2157_s24, 16  ;;  %s2447_s14 = scalar_lea.hbm %s3367_s11, 64 }
 0x966   : > { %p2444_p4 = scmp.ne.s32.totalorder %s2157_s24, %s2443_s13  ;;  %p2448_p9 = scmp.lt.s32.totalorder %s2157_s24, %s3367_s11 }
 0x967   : > { %p2449_p10 = scmp.lt.s32.totalorder %s2447_s14, %s2443_s13 }
 0x968   : > { %p2445_p7 = pnand %p2444_p4, %p2603_p5 }
 0x969   : > { %p2450_p11 = por %p2449_p10, %p2448_p9 }
 0x96a   : > { %p2446_p8 = pneg %p2445_p7 }
 0x96c   : > { %p2451_p12 = pnand %p2450_p11, %p2446_p8 }
 0x96e   : > { %2454 = shalt.err (!%p2451_p12)
}
 0x96f   : > { %2268 = dma.vmem_to_hbm [thread:$0]  (%p2603_p5), %s2160_s15, 16, %s2157_s24, %s2147_s25  }
 0x970 PF: > { %p2274_p13 = scmp.ge.s32.totalorder %s2489_s20, 2  ;;  %s2171_s0 = sand.u32 1, %s2477_s17  }
 0x971   : > { %s2172_s30 = scalar_lea.sflag [#allocation3], %s2171_s0 }
 0x972   : > { %p2271_p0 = pnand %p2274_p13, %p2607_p6 }
 0x974   : > { %p2272_p1 = pneg %p2271_p0 }
 0x976   : > { %2472 = dma.done.wait (%p2272_p1), %s2172_s30, 16  }
 0x977   : > { %2474 = vsyncadd (%p2272_p1), %s2172_s30, 4294967280  ;;  %s3377_s29 = sld [smem:[#allocation5_spill]]  ;;  %p21_p2 = scmp.ge.s32.totalorder %s2590_s23, 6  }
 0x978   : > { %s3378_s17 = smov %s2481_s18  ;;  %s3379_s18 = smov %s2485_s19 }
 0x979   : > { %s3381_s20 = smov %s2590_s23  ;;  %23 = sbr.rel (!%p21_p2) target bundleno = 5 (0x5), region = 99 }
 0x97d   : > { %s3380_s19 = smov %s3377_s29 }
 0x97e   :  { %2176 = vsyncpa [#allocation3], 1 }
 0x97f   :  { %2178 = vsyncpa [#allocation3 + $0x1], 1 }

</bundles_post_ra>
